<compile_context>
chip_gen: v5e
topology: v5e:2x2
jax: 0.10.0
libtpu: 0.0.40
codegen_flags: <defaults>
</compile_context>

<pallas_src>
import functools
import math

import jax
import jax.numpy as jnp
import numpy as np
from jax.experimental import pallas as pl
from jax.experimental.pallas import tpu as pltpu

STATE_DIM = 4
HISTORY_LEN = 8
N_LAYERS = 2
N_HEADS = 4
HIDDEN_DIM = 32
HEAD_DIM = HIDDEN_DIM // N_HEADS
BATCH = 2
LN_EPS = 1e-5


# ----------------------------------------------------------------------------
# Fused Pallas kernel
# ----------------------------------------------------------------------------
def _layer_norm_in_kernel(x, g, b):
    mu = jnp.mean(x, axis=-1, keepdims=True)
    var = jnp.mean((x - mu) ** 2, axis=-1, keepdims=True)
    return (x - mu) * jax.lax.rsqrt(var + LN_EPS) * g + b


def _fused_kernel(alpha_ref, x_ref, w1_ref, w23_ref, bm_ref,
                  wqkv_ref, bqkv_ref, lw_ref, lv_ref, o_ref, *,
                  batch, seq_len, n_layers, n_heads, head_dim):
    B, L = batch, seq_len
    BL = B * L
    D = o_ref.shape[-1]
    scale = 1.0 / math.sqrt(head_dim)

    # ---- state-encoder MLP: Linear -> PReLU -> Linear -> PReLU -> Linear ----
    bm = bm_ref[...]                                   # (3, D): b1, b2, b3
    w23 = w23_ref[...]                                 # (2, D, D): w2, w3
    x = x_ref[...]                                     # (B*L, S)
    h = jnp.dot(x, w1_ref[...], preferred_element_type=jnp.float32) + bm[0:1]
    h = jnp.where(h >= 0.0, h, alpha_ref[0] * h)       # PReLU (SMEM scalar)
    h = jnp.dot(h, w23[0], preferred_element_type=jnp.float32) + bm[1:2]
    h = jnp.where(h >= 0.0, h, alpha_ref[1] * h)
    x = jnp.dot(h, w23[1], preferred_element_type=jnp.float32) + bm[2:3]
    # x: (B*L, D)

    # ---- transformer encoder layers (post-LN, ReLU FF, batch_first) ----
    for li in range(n_layers):
        wqkv = wqkv_ref[li]                            # (D, 3D): wq|wk|wv
        bqkv = bqkv_ref[li:li + 1]                     # (1, 3D): bq|bk|bv
        lw = lw_ref[li]                                # (3, D, D): wo, wf1, wf2
        lv = lv_ref[li]                                # (7, D): bo,g1,be1,bf1,bf2,g2,be2

        # Fused Q/K/V projection: one (BL,D)@(D,3D) MXU matmul.
        qkv = jnp.dot(x, wqkv, preferred_element_type=jnp.float32) + bqkv

        # Per-head scaled-dot-product attention, contexts kept in registers.
        ctx_heads = []
        for hd in range(n_heads):
            q0 = hd * head_dim
            k0 = D + hd * head_dim
            v0 = 2 * D + hd * head_dim
            qh = qkv[:, q0:q0 + head_dim].reshape(B, L, head_dim)
            kh = qkv[:, k0:k0 + head_dim].reshape(B, L, head_dim)
            vh = qkv[:, v0:v0 + head_dim].reshape(B, L, head_dim)
            s = jnp.einsum('ble,bme->blm', qh, kh,
                           preferred_element_type=jnp.float32) * scale
            s = s - jnp.max(s, axis=-1, keepdims=True)
            p = jnp.exp(s)
            p = p * pl.reciprocal(jnp.sum(p, axis=-1, keepdims=True),
                                  approx=True)
            ch = jnp.einsum('blm,bme->ble', p, vh,
                            preferred_element_type=jnp.float32)
            ctx_heads.append(ch.reshape(BL, head_dim))
        ctx = jnp.concatenate(ctx_heads, axis=-1)      # (BL, D)

        attn = jnp.dot(ctx, lw[0], preferred_element_type=jnp.float32) + lv[0:1]

        # residual + LayerNorm 1
        x = _layer_norm_in_kernel(x + attn, lv[1:2], lv[2:3])

        # Feed-forward (dim_feedforward == hidden_dim), ReLU.
        ffh = jnp.maximum(
            jnp.dot(x, lw[1], preferred_element_type=jnp.float32) + lv[3:4],
            0.0)
        ff = jnp.dot(ffh, lw[2], preferred_element_type=jnp.float32) + lv[4:5]

        # residual + LayerNorm 2
        x = _layer_norm_in_kernel(x + ff, lv[5:6], lv[6:7])

    # ---- softmax(mean over D) attention pooling over L ----
    xs = x.reshape(B, L, D)
    m = jnp.mean(xs, axis=-1)                          # (B, L)
    m = m - jnp.max(m, axis=-1, keepdims=True)
    w = jnp.exp(m)
    w = w * pl.reciprocal(jnp.sum(w, axis=-1, keepdims=True), approx=True)
    o_ref[...] = jnp.sum(xs * w[:, :, None], axis=1)   # (B, D)


# ----------------------------------------------------------------------------
# Wrapper
# ----------------------------------------------------------------------------
def transformer_hist_forward(history, params):
    B, L, S = history.shape
    x2d = history.reshape(B * L, S)
    kernel = functools.partial(
        _fused_kernel, batch=B, seq_len=L, n_layers=N_LAYERS,
        n_heads=N_HEADS, head_dim=HEAD_DIM)
    smem = pl.BlockSpec(memory_space=pltpu.MemorySpace.SMEM)
    vmem = pl.BlockSpec(memory_space=pltpu.MemorySpace.VMEM)
    return pl.pallas_call(
        kernel,
        out_shape=jax.ShapeDtypeStruct((B, HIDDEN_DIM), jnp.float32),
        in_specs=[smem, vmem, vmem, vmem, vmem, vmem, vmem, vmem, vmem],
        out_specs=vmem,
    )(params["alphas"], x2d, params["mlp_w1"], params["mlp_w23"],
      params["mlp_b"], params["layer_wqkv"], params["layer_bqkv"],
      params["layer_w"], params["layer_v"])


# ----------------------------------------------------------------------------
# Deterministic parameter init (pre-packed slabs) + exact numpy reference
# ----------------------------------------------------------------------------
def init_params(key):
    D, S = HIDDEN_DIM, STATE_DIM
    keys = iter(jax.random.split(key, 64))

    def mat(shape, fan_in):
        return jax.random.normal(next(keys), shape, jnp.float32) / math.sqrt(fan_in)

    def vec(dim):
        return 0.01 * jax.random.normal(next(keys), (dim,), jnp.float32)

    mlp_w1 = mat((S, D), S)
    mlp_w23 = jnp.stack([mat((D, D), D), mat((D, D), D)])          # w2, w3
    mlp_b = jnp.stack([vec(D), vec(D), vec(D)])                    # b1, b2, b3
    alphas = jnp.full((2,), 0.25, jnp.float32)                     # PReLU defaults

    layer_wqkv, layer_bqkv, layer_w, layer_v = [], [], [], []
    for _ in range(N_LAYERS):
        wq, wk, wv = mat((D, D), D), mat((D, D), D), mat((D, D), D)
        wo = mat((D, D), D)
        wf1, wf2 = mat((D, D), D), mat((D, D), D)
        bq, bk, bv, bo = vec(D), vec(D), vec(D), vec(D)
        bf1, bf2 = vec(D), vec(D)
        g1, be1 = jnp.ones((D,), jnp.float32), jnp.zeros((D,), jnp.float32)
        g2, be2 = jnp.ones((D,), jnp.float32), jnp.zeros((D,), jnp.float32)
        layer_wqkv.append(jnp.concatenate([wq, wk, wv], axis=1))   # (D, 3D)
        layer_bqkv.append(jnp.concatenate([bq, bk, bv]))           # (3D,)
        layer_w.append(jnp.stack([wo, wf1, wf2]))                  # (3, D, D)
        layer_v.append(jnp.stack([bo, g1, be1, bf1, bf2, g2, be2]))  # (7, D)

    return dict(alphas=alphas, mlp_w1=mlp_w1, mlp_w23=mlp_w23, mlp_b=mlp_b,
                layer_wqkv=jnp.stack(layer_wqkv),
                layer_bqkv=jnp.stack(layer_bqkv),
                layer_w=jnp.stack(layer_w), layer_v=jnp.stack(layer_v))


def ref_forward(history, params):
    """Exact float64 numpy reference of the PyTorch forward pass."""
    f = lambda a: np.asarray(a, dtype=np.float64)
    B, L, S = history.shape
    D, H, dh = HIDDEN_DIM, N_HEADS, HEAD_DIM
    hist = f(history)
    w1, w23, bm = f(params["mlp_w1"]), f(params["mlp_w23"]), f(params["mlp_b"])
    alphas = f(params["alphas"])
    wqkv_all, bqkv_all = f(params["layer_wqkv"]), f(params["layer_bqkv"])
    lw_all, lv_all = f(params["layer_w"]), f(params["layer_v"])

    def layer_norm(x, g, b):
        mu = x.mean(-1, keepdims=True)
        var = ((x - mu) ** 2).mean(-1, keepdims=True)
        return (x - mu) / np.sqrt(var + LN_EPS) * g + b

    def softmax(x, axis):
        x = x - x.max(axis=axis, keepdims=True)
        e = np.exp(x)
        return e / e.sum(axis=axis, keepdims=True)

    x = hist.reshape(B * L, S)
    h = x @ w1 + bm[0]
    h = np.where(h >= 0.0, h, alphas[0] * h)
    h = h @ w23[0] + bm[1]
    h = np.where(h >= 0.0, h, alphas[1] * h)
    x = (h @ w23[1] + bm[2]).reshape(B, L, D)

    for li in range(N_LAYERS):
        wqkv, bqkv = wqkv_all[li], bqkv_all[li]
        wq, wk, wv = wqkv[:, :D], wqkv[:, D:2 * D], wqkv[:, 2 * D:]
        bq, bk, bv = bqkv[:D], bqkv[D:2 * D], bqkv[2 * D:]
        wo, wf1, wf2 = lw_all[li]
        bo, g1, be1, bf1, bf2, g2, be2 = lv_all[li]
        q = x @ wq + bq
        k = x @ wk + bk
        v = x @ wv + bv
        qh = q.reshape(B, L, H, dh).transpose(0, 2, 1, 3)
        kh = k.reshape(B, L, H, dh).transpose(0, 2, 1, 3)
        vh = v.reshape(B, L, H, dh).transpose(0, 2, 1, 3)
        s = qh @ kh.transpose(0, 1, 3, 2) / math.sqrt(dh)
        p = softmax(s, -1)
        ctx = (p @ vh).transpose(0, 2, 1, 3).reshape(B, L, D)
        sa = ctx @ wo + bo
        x = layer_norm(x + sa, g1, be1)
        ff = np.maximum(x @ wf1 + bf1, 0.0) @ wf2 + bf2
        x = layer_norm(x + ff, g2, be2)

    w = softmax(x.mean(-1), -1)
    return (x * w[:, :, None]).sum(axis=1)


# ----------------------------------------------------------------------------
if __name__ == "__main__":
    key = jax.random.PRNGKey(0)
    pkey, xkey = jax.random.split(key)
    params = init_params(pkey)
    history = jax.random.normal(xkey, (BATCH, HISTORY_LEN, STATE_DIM), jnp.float32)

    out = jax.jit(transformer_hist_forward)(history, params)
    out = jax.block_until_ready(out)

    ref = ref_forward(history, params)
    assert out.shape == (BATCH, HIDDEN_DIM)
    # Tolerance accounts for default (single-pass bf16) MXU precision and the
    # approximate-reciprocal softmax denominators vs. the exact f64 reference.
    np.testing.assert_allclose(np.asarray(out), ref, atol=2e-2, rtol=2e-2)
    print("KERNEL_OK")
</pallas_src>

<mosaic_0001>
module attributes {stable_mosaic.version = 11 : i64} {
  func.func @_fused_kernel(%arg0: memref<2xf32, #tpu.memory_space<smem>>, %arg1: memref<16x4xf32, #tpu.memory_space<vmem>>, %arg2: memref<4x32xf32, #tpu.memory_space<vmem>>, %arg3: memref<2x32x32xf32, #tpu.memory_space<vmem>>, %arg4: memref<3x32xf32, #tpu.memory_space<vmem>>, %arg5: memref<2x32x96xf32, #tpu.memory_space<vmem>>, %arg6: memref<2x96xf32, #tpu.memory_space<vmem>>, %arg7: memref<2x3x32x32xf32, #tpu.memory_space<vmem>>, %arg8: memref<2x7x32xf32, #tpu.memory_space<vmem>>, %arg9: memref<2x32xf32, #tpu.memory_space<vmem>>) attributes {dimension_semantics = [], scalar_prefetch = 0 : i64, scratch_operands = 0 : i64, tpu.core_type = #tpu.core_type<tc>} {
    %c0 = arith.constant 0 : index
    %c0_0 = arith.constant 0 : index
    %0 = vector.load %arg4[%c0, %c0_0] : memref<3x32xf32, #tpu.memory_space<vmem>>, vector<3x32xf32>
    %c0_1 = arith.constant 0 : index
    %c0_2 = arith.constant 0 : index
    %c0_3 = arith.constant 0 : index
    %1 = vector.load %arg3[%c0_1, %c0_2, %c0_3] : memref<2x32x32xf32, #tpu.memory_space<vmem>>, vector<2x32x32xf32>
    %c0_4 = arith.constant 0 : index
    %c0_5 = arith.constant 0 : index
    %2 = vector.load %arg1[%c0_4, %c0_5] : memref<16x4xf32, #tpu.memory_space<vmem>>, vector<16x4xf32>
    %c0_6 = arith.constant 0 : index
    %c0_7 = arith.constant 0 : index
    %3 = vector.load %arg2[%c0_6, %c0_7] : memref<4x32xf32, #tpu.memory_space<vmem>>, vector<4x32xf32>
    %cst = arith.constant dense<0.000000e+00> : vector<16x32xf32>
    %4 = tpu.matmul %2, %3, %cst {dimension_numbers = #tpu.dot_dimension_numbers<[1], [0], [0], [1], [0, 0, 1, 1], [], []>} : vector<16x4xf32>, vector<4x32xf32>, vector<16x32xf32> -> vector<16x32xf32>
    %5 = vector.extract_strided_slice %0 {offsets = [0, 0], sizes = [1, 32], strides = [1, 1]} : vector<3x32xf32> to vector<1x32xf32>
    %6 = vector.broadcast %5 : vector<1x32xf32> to vector<16x32xf32>
    %7 = arith.addf %4, %6 : vector<16x32xf32>
    %cst_8 = arith.constant 0.000000e+00 : f32
    %8 = vector.broadcast %cst_8 : f32 to vector<16x32xf32>
    %9 = arith.cmpf oge, %7, %8 : vector<16x32xf32>
    %c0_9 = arith.constant 0 : index
    %10 = memref.load %arg0[%c0_9] : memref<2xf32, #tpu.memory_space<smem>>
    %11 = vector.broadcast %10 : f32 to vector<16x32xf32>
    %12 = arith.mulf %11, %7 : vector<16x32xf32>
    %13 = arith.select %9, %7, %12 : vector<16x32xi1>, vector<16x32xf32>
    %14 = vector.extract_strided_slice %1 {offsets = [0, 0, 0], sizes = [1, 32, 32], strides = [1, 1, 1]} : vector<2x32x32xf32> to vector<1x32x32xf32>
    %15 = vector.shape_cast %14 : vector<1x32x32xf32> to vector<32x32xf32>
    %cst_10 = arith.constant dense<0.000000e+00> : vector<16x32xf32>
    %16 = tpu.matmul %13, %15, %cst_10 {dimension_numbers = #tpu.dot_dimension_numbers<[1], [0], [0], [1], [0, 0, 1, 1], [], []>} : vector<16x32xf32>, vector<32x32xf32>, vector<16x32xf32> -> vector<16x32xf32>
    %17 = vector.extract_strided_slice %0 {offsets = [1, 0], sizes = [1, 32], strides = [1, 1]} : vector<3x32xf32> to vector<1x32xf32>
    %18 = vector.broadcast %17 : vector<1x32xf32> to vector<16x32xf32>
    %19 = arith.addf %16, %18 : vector<16x32xf32>
    %cst_11 = arith.constant 0.000000e+00 : f32
    %20 = vector.broadcast %cst_11 : f32 to vector<16x32xf32>
    %21 = arith.cmpf oge, %19, %20 : vector<16x32xf32>
    %c1 = arith.constant 1 : index
    %22 = memref.load %arg0[%c1] : memref<2xf32, #tpu.memory_space<smem>>
    %23 = vector.broadcast %22 : f32 to vector<16x32xf32>
    %24 = arith.mulf %23, %19 : vector<16x32xf32>
    %25 = arith.select %21, %19, %24 : vector<16x32xi1>, vector<16x32xf32>
    %26 = vector.extract_strided_slice %1 {offsets = [1, 0, 0], sizes = [1, 32, 32], strides = [1, 1, 1]} : vector<2x32x32xf32> to vector<1x32x32xf32>
    %27 = vector.shape_cast %26 : vector<1x32x32xf32> to vector<32x32xf32>
    %cst_12 = arith.constant dense<0.000000e+00> : vector<16x32xf32>
    %28 = tpu.matmul %25, %27, %cst_12 {dimension_numbers = #tpu.dot_dimension_numbers<[1], [0], [0], [1], [0, 0, 1, 1], [], []>} : vector<16x32xf32>, vector<32x32xf32>, vector<16x32xf32> -> vector<16x32xf32>
    %29 = vector.extract_strided_slice %0 {offsets = [2, 0], sizes = [1, 32], strides = [1, 1]} : vector<3x32xf32> to vector<1x32xf32>
    %30 = vector.broadcast %29 : vector<1x32xf32> to vector<16x32xf32>
    %31 = arith.addf %28, %30 : vector<16x32xf32>
    %c0_13 = arith.constant 0 : index
    %c0_14 = arith.constant 0 : index
    %c0_15 = arith.constant 0 : index
    %32 = vector.load %arg5[%c0_13, %c0_14, %c0_15] : memref<2x32x96xf32, #tpu.memory_space<vmem>>, vector<1x32x96xf32>
    %33 = vector.shape_cast %32 : vector<1x32x96xf32> to vector<32x96xf32>
    %c0_16 = arith.constant 0 : index
    %c0_17 = arith.constant 0 : index
    %34 = vector.load %arg6[%c0_16, %c0_17] : memref<2x96xf32, #tpu.memory_space<vmem>>, vector<1x96xf32>
    %c0_18 = arith.constant 0 : index
    %c0_19 = arith.constant 0 : index
    %c0_20 = arith.constant 0 : index
    %c0_21 = arith.constant 0 : index
    %35 = vector.load %arg7[%c0_18, %c0_19, %c0_20, %c0_21] : memref<2x3x32x32xf32, #tpu.memory_space<vmem>>, vector<1x3x32x32xf32>
    %36 = vector.shape_cast %35 : vector<1x3x32x32xf32> to vector<3x32x32xf32>
    %c0_22 = arith.constant 0 : index
    %c0_23 = arith.constant 0 : index
    %c0_24 = arith.constant 0 : index
    %37 = vector.load %arg8[%c0_22, %c0_23, %c0_24] : memref<2x7x32xf32, #tpu.memory_space<vmem>>, vector<1x7x32xf32>
    %38 = vector.shape_cast %37 : vector<1x7x32xf32> to vector<7x32xf32>
    %cst_25 = arith.constant dense<0.000000e+00> : vector<16x96xf32>
    %39 = tpu.matmul %31, %33, %cst_25 {dimension_numbers = #tpu.dot_dimension_numbers<[1], [0], [0], [1], [0, 0, 1, 1], [], []>} : vector<16x32xf32>, vector<32x96xf32>, vector<16x96xf32> -> vector<16x96xf32>
    %40 = vector.broadcast %34 : vector<1x96xf32> to vector<16x96xf32>
    %41 = arith.addf %39, %40 : vector<16x96xf32>
    %42 = vector.extract_strided_slice %41 {offsets = [0, 0], sizes = [16, 8], strides = [1, 1]} : vector<16x96xf32> to vector<16x8xf32>
    %43 = vector.shape_cast %42 : vector<16x8xf32> to vector<2x8x8xf32>
    %44 = vector.extract_strided_slice %41 {offsets = [0, 32], sizes = [16, 8], strides = [1, 1]} : vector<16x96xf32> to vector<16x8xf32>
    %45 = vector.shape_cast %44 : vector<16x8xf32> to vector<2x8x8xf32>
    %46 = vector.extract_strided_slice %41 {offsets = [0, 64], sizes = [16, 8], strides = [1, 1]} : vector<16x96xf32> to vector<16x8xf32>
    %47 = vector.shape_cast %46 : vector<16x8xf32> to vector<2x8x8xf32>
    "tpu.trace_start"() <{level = 10 : i32, message = "ble,bme->blm"}> : () -> ()
    %cst_26 = arith.constant dense<0.000000e+00> : vector<2x8x8xf32>
    %48 = tpu.matmul %43, %45, %cst_26 {dimension_numbers = #tpu.dot_dimension_numbers<[2], [2], [1], [1], [0, 0, 0, 1, 1, 1], [0], [0]>} : vector<2x8x8xf32>, vector<2x8x8xf32>, vector<2x8x8xf32> -> vector<2x8x8xf32>
    "tpu.trace_stop"() : () -> ()
    %cst_27 = arith.constant 0.353553385 : f32
    %49 = vector.broadcast %cst_27 : f32 to vector<2x8x8xf32>
    %50 = arith.mulf %48, %49 : vector<2x8x8xf32>
    %cst_28 = arith.constant dense<0xFF800000> : vector<2x8xf32>
    %51 = vector.multi_reduction <maximumf>, %50, %cst_28 [2] : vector<2x8x8xf32> to vector<2x8xf32>
    %52 = vector.shape_cast %51 : vector<2x8xf32> to vector<2x8x1xf32>
    %53 = vector.broadcast %52 : vector<2x8x1xf32> to vector<2x8x8xf32>
    %54 = arith.subf %50, %53 : vector<2x8x8xf32>
    %55 = math.exp %54 : vector<2x8x8xf32>
    %cst_29 = arith.constant dense<0.000000e+00> : vector<2x8xf32>
    %56 = vector.multi_reduction <add>, %55, %cst_29 [2] : vector<2x8x8xf32> to vector<2x8xf32>
    %57 = vector.shape_cast %56 : vector<2x8xf32> to vector<2x8x1xf32>
    %58 = tpu.reciprocal %57 {approx = true} : vector<2x8x1xf32> -> vector<2x8x1xf32>
    %59 = vector.broadcast %58 : vector<2x8x1xf32> to vector<2x8x8xf32>
    %60 = arith.mulf %55, %59 : vector<2x8x8xf32>
    "tpu.trace_start"() <{level = 10 : i32, message = "blm,bme->ble"}> : () -> ()
    %cst_30 = arith.constant dense<0.000000e+00> : vector<2x8x8xf32>
    %61 = tpu.matmul %60, %47, %cst_30 {dimension_numbers = #tpu.dot_dimension_numbers<[2], [1], [1], [2], [0, 0, 0, 1, 1, 2], [0], [0]>} : vector<2x8x8xf32>, vector<2x8x8xf32>, vector<2x8x8xf32> -> vector<2x8x8xf32>
    "tpu.trace_stop"() : () -> ()
    %62 = vector.shape_cast %61 : vector<2x8x8xf32> to vector<16x8xf32>
    %63 = vector.extract_strided_slice %41 {offsets = [0, 8], sizes = [16, 8], strides = [1, 1]} : vector<16x96xf32> to vector<16x8xf32>
    %64 = vector.shape_cast %63 : vector<16x8xf32> to vector<2x8x8xf32>
    %65 = vector.extract_strided_slice %41 {offsets = [0, 40], sizes = [16, 8], strides = [1, 1]} : vector<16x96xf32> to vector<16x8xf32>
    %66 = vector.shape_cast %65 : vector<16x8xf32> to vector<2x8x8xf32>
    %67 = vector.extract_strided_slice %41 {offsets = [0, 72], sizes = [16, 8], strides = [1, 1]} : vector<16x96xf32> to vector<16x8xf32>
    %68 = vector.shape_cast %67 : vector<16x8xf32> to vector<2x8x8xf32>
    "tpu.trace_start"() <{level = 10 : i32, message = "ble,bme->blm"}> : () -> ()
    %cst_31 = arith.constant dense<0.000000e+00> : vector<2x8x8xf32>
    %69 = tpu.matmul %64, %66, %cst_31 {dimension_numbers = #tpu.dot_dimension_numbers<[2], [2], [1], [1], [0, 0, 0, 1, 1, 1], [0], [0]>} : vector<2x8x8xf32>, vector<2x8x8xf32>, vector<2x8x8xf32> -> vector<2x8x8xf32>
    "tpu.trace_stop"() : () -> ()
    %cst_32 = arith.constant 0.353553385 : f32
    %70 = vector.broadcast %cst_32 : f32 to vector<2x8x8xf32>
    %71 = arith.mulf %69, %70 : vector<2x8x8xf32>
    %cst_33 = arith.constant dense<0xFF800000> : vector<2x8xf32>
    %72 = vector.multi_reduction <maximumf>, %71, %cst_33 [2] : vector<2x8x8xf32> to vector<2x8xf32>
    %73 = vector.shape_cast %72 : vector<2x8xf32> to vector<2x8x1xf32>
    %74 = vector.broadcast %73 : vector<2x8x1xf32> to vector<2x8x8xf32>
    %75 = arith.subf %71, %74 : vector<2x8x8xf32>
    %76 = math.exp %75 : vector<2x8x8xf32>
    %cst_34 = arith.constant dense<0.000000e+00> : vector<2x8xf32>
    %77 = vector.multi_reduction <add>, %76, %cst_34 [2] : vector<2x8x8xf32> to vector<2x8xf32>
    %78 = vector.shape_cast %77 : vector<2x8xf32> to vector<2x8x1xf32>
    %79 = tpu.reciprocal %78 {approx = true} : vector<2x8x1xf32> -> vector<2x8x1xf32>
    %80 = vector.broadcast %79 : vector<2x8x1xf32> to vector<2x8x8xf32>
    %81 = arith.mulf %76, %80 : vector<2x8x8xf32>
    "tpu.trace_start"() <{level = 10 : i32, message = "blm,bme->ble"}> : () -> ()
    %cst_35 = arith.constant dense<0.000000e+00> : vector<2x8x8xf32>
    %82 = tpu.matmul %81, %68, %cst_35 {dimension_numbers = #tpu.dot_dimension_numbers<[2], [1], [1], [2], [0, 0, 0, 1, 1, 2], [0], [0]>} : vector<2x8x8xf32>, vector<2x8x8xf32>, vector<2x8x8xf32> -> vector<2x8x8xf32>
    "tpu.trace_stop"() : () -> ()
    %83 = vector.shape_cast %82 : vector<2x8x8xf32> to vector<16x8xf32>
    %84 = vector.extract_strided_slice %41 {offsets = [0, 16], sizes = [16, 8], strides = [1, 1]} : vector<16x96xf32> to vector<16x8xf32>
    %85 = vector.shape_cast %84 : vector<16x8xf32> to vector<2x8x8xf32>
    %86 = vector.extract_strided_slice %41 {offsets = [0, 48], sizes = [16, 8], strides = [1, 1]} : vector<16x96xf32> to vector<16x8xf32>
    %87 = vector.shape_cast %86 : vector<16x8xf32> to vector<2x8x8xf32>
    %88 = vector.extract_strided_slice %41 {offsets = [0, 80], sizes = [16, 8], strides = [1, 1]} : vector<16x96xf32> to vector<16x8xf32>
    %89 = vector.shape_cast %88 : vector<16x8xf32> to vector<2x8x8xf32>
    "tpu.trace_start"() <{level = 10 : i32, message = "ble,bme->blm"}> : () -> ()
    %cst_36 = arith.constant dense<0.000000e+00> : vector<2x8x8xf32>
    %90 = tpu.matmul %85, %87, %cst_36 {dimension_numbers = #tpu.dot_dimension_numbers<[2], [2], [1], [1], [0, 0, 0, 1, 1, 1], [0], [0]>} : vector<2x8x8xf32>, vector<2x8x8xf32>, vector<2x8x8xf32> -> vector<2x8x8xf32>
    "tpu.trace_stop"() : () -> ()
    %cst_37 = arith.constant 0.353553385 : f32
    %91 = vector.broadcast %cst_37 : f32 to vector<2x8x8xf32>
    %92 = arith.mulf %90, %91 : vector<2x8x8xf32>
    %cst_38 = arith.constant dense<0xFF800000> : vector<2x8xf32>
    %93 = vector.multi_reduction <maximumf>, %92, %cst_38 [2] : vector<2x8x8xf32> to vector<2x8xf32>
    %94 = vector.shape_cast %93 : vector<2x8xf32> to vector<2x8x1xf32>
    %95 = vector.broadcast %94 : vector<2x8x1xf32> to vector<2x8x8xf32>
    %96 = arith.subf %92, %95 : vector<2x8x8xf32>
    %97 = math.exp %96 : vector<2x8x8xf32>
    %cst_39 = arith.constant dense<0.000000e+00> : vector<2x8xf32>
    %98 = vector.multi_reduction <add>, %97, %cst_39 [2] : vector<2x8x8xf32> to vector<2x8xf32>
    %99 = vector.shape_cast %98 : vector<2x8xf32> to vector<2x8x1xf32>
    %100 = tpu.reciprocal %99 {approx = true} : vector<2x8x1xf32> -> vector<2x8x1xf32>
    %101 = vector.broadcast %100 : vector<2x8x1xf32> to vector<2x8x8xf32>
    %102 = arith.mulf %97, %101 : vector<2x8x8xf32>
    "tpu.trace_start"() <{level = 10 : i32, message = "blm,bme->ble"}> : () -> ()
    %cst_40 = arith.constant dense<0.000000e+00> : vector<2x8x8xf32>
    %103 = tpu.matmul %102, %89, %cst_40 {dimension_numbers = #tpu.dot_dimension_numbers<[2], [1], [1], [2], [0, 0, 0, 1, 1, 2], [0], [0]>} : vector<2x8x8xf32>, vector<2x8x8xf32>, vector<2x8x8xf32> -> vector<2x8x8xf32>
    "tpu.trace_stop"() : () -> ()
    %104 = vector.shape_cast %103 : vector<2x8x8xf32> to vector<16x8xf32>
    %105 = vector.extract_strided_slice %41 {offsets = [0, 24], sizes = [16, 8], strides = [1, 1]} : vector<16x96xf32> to vector<16x8xf32>
    %106 = vector.shape_cast %105 : vector<16x8xf32> to vector<2x8x8xf32>
    %107 = vector.extract_strided_slice %41 {offsets = [0, 56], sizes = [16, 8], strides = [1, 1]} : vector<16x96xf32> to vector<16x8xf32>
    %108 = vector.shape_cast %107 : vector<16x8xf32> to vector<2x8x8xf32>
    %109 = vector.extract_strided_slice %41 {offsets = [0, 88], sizes = [16, 8], strides = [1, 1]} : vector<16x96xf32> to vector<16x8xf32>
    %110 = vector.shape_cast %109 : vector<16x8xf32> to vector<2x8x8xf32>
    "tpu.trace_start"() <{level = 10 : i32, message = "ble,bme->blm"}> : () -> ()
    %cst_41 = arith.constant dense<0.000000e+00> : vector<2x8x8xf32>
    %111 = tpu.matmul %106, %108, %cst_41 {dimension_numbers = #tpu.dot_dimension_numbers<[2], [2], [1], [1], [0, 0, 0, 1, 1, 1], [0], [0]>} : vector<2x8x8xf32>, vector<2x8x8xf32>, vector<2x8x8xf32> -> vector<2x8x8xf32>
    "tpu.trace_stop"() : () -> ()
    %cst_42 = arith.constant 0.353553385 : f32
    %112 = vector.broadcast %cst_42 : f32 to vector<2x8x8xf32>
    %113 = arith.mulf %111, %112 : vector<2x8x8xf32>
    %cst_43 = arith.constant dense<0xFF800000> : vector<2x8xf32>
    %114 = vector.multi_reduction <maximumf>, %113, %cst_43 [2] : vector<2x8x8xf32> to vector<2x8xf32>
    %115 = vector.shape_cast %114 : vector<2x8xf32> to vector<2x8x1xf32>
    %116 = vector.broadcast %115 : vector<2x8x1xf32> to vector<2x8x8xf32>
    %117 = arith.subf %113, %116 : vector<2x8x8xf32>
    %118 = math.exp %117 : vector<2x8x8xf32>
    %cst_44 = arith.constant dense<0.000000e+00> : vector<2x8xf32>
    %119 = vector.multi_reduction <add>, %118, %cst_44 [2] : vector<2x8x8xf32> to vector<2x8xf32>
    %120 = vector.shape_cast %119 : vector<2x8xf32> to vector<2x8x1xf32>
    %121 = tpu.reciprocal %120 {approx = true} : vector<2x8x1xf32> -> vector<2x8x1xf32>
    %122 = vector.broadcast %121 : vector<2x8x1xf32> to vector<2x8x8xf32>
    %123 = arith.mulf %118, %122 : vector<2x8x8xf32>
    "tpu.trace_start"() <{level = 10 : i32, message = "blm,bme->ble"}> : () -> ()
    %cst_45 = arith.constant dense<0.000000e+00> : vector<2x8x8xf32>
    %124 = tpu.matmul %123, %110, %cst_45 {dimension_numbers = #tpu.dot_dimension_numbers<[2], [1], [1], [2], [0, 0, 0, 1, 1, 2], [0], [0]>} : vector<2x8x8xf32>, vector<2x8x8xf32>, vector<2x8x8xf32> -> vector<2x8x8xf32>
    "tpu.trace_stop"() : () -> ()
    %125 = vector.shape_cast %124 : vector<2x8x8xf32> to vector<16x8xf32>
    %126 = tpu.concatenate %62, %83, %104, %125 in 1 : vector<16x8xf32>, vector<16x8xf32>, vector<16x8xf32>, vector<16x8xf32> -> vector<16x32xf32>
    %127 = vector.extract_strided_slice %36 {offsets = [0, 0, 0], sizes = [1, 32, 32], strides = [1, 1, 1]} : vector<3x32x32xf32> to vector<1x32x32xf32>
    %128 = vector.shape_cast %127 : vector<1x32x32xf32> to vector<32x32xf32>
    %cst_46 = arith.constant dense<0.000000e+00> : vector<16x32xf32>
    %129 = tpu.matmul %126, %128, %cst_46 {dimension_numbers = #tpu.dot_dimension_numbers<[1], [0], [0], [1], [0, 0, 1, 1], [], []>} : vector<16x32xf32>, vector<32x32xf32>, vector<16x32xf32> -> vector<16x32xf32>
    %130 = vector.extract_strided_slice %38 {offsets = [0, 0], sizes = [1, 32], strides = [1, 1]} : vector<7x32xf32> to vector<1x32xf32>
    %131 = vector.broadcast %130 : vector<1x32xf32> to vector<16x32xf32>
    %132 = arith.addf %129, %131 : vector<16x32xf32>
    %133 = arith.addf %31, %132 : vector<16x32xf32>
    %134 = vector.extract_strided_slice %38 {offsets = [1, 0], sizes = [1, 32], strides = [1, 1]} : vector<7x32xf32> to vector<1x32xf32>
    %135 = vector.extract_strided_slice %38 {offsets = [2, 0], sizes = [1, 32], strides = [1, 1]} : vector<7x32xf32> to vector<1x32xf32>
    %cst_47 = arith.constant dense<0.000000e+00> : vector<16xf32>
    %136 = vector.multi_reduction <add>, %133, %cst_47 [1] : vector<16x32xf32> to vector<16xf32>
    %137 = vector.shape_cast %136 : vector<16xf32> to vector<16x1xf32>
    %cst_48 = arith.constant 3.200000e+01 : f32
    %138 = vector.broadcast %cst_48 : f32 to vector<16x1xf32>
    %139 = arith.divf %137, %138 : vector<16x1xf32>
    %140 = vector.broadcast %139 : vector<16x1xf32> to vector<16x32xf32>
    %141 = arith.subf %133, %140 : vector<16x32xf32>
    %142 = arith.mulf %141, %141 : vector<16x32xf32>
    %cst_49 = arith.constant dense<0.000000e+00> : vector<16xf32>
    %143 = vector.multi_reduction <add>, %142, %cst_49 [1] : vector<16x32xf32> to vector<16xf32>
    %144 = vector.shape_cast %143 : vector<16xf32> to vector<16x1xf32>
    %cst_50 = arith.constant 3.200000e+01 : f32
    %145 = vector.broadcast %cst_50 : f32 to vector<16x1xf32>
    %146 = arith.divf %144, %145 : vector<16x1xf32>
    %147 = vector.broadcast %139 : vector<16x1xf32> to vector<16x32xf32>
    %148 = arith.subf %133, %147 : vector<16x32xf32>
    %cst_51 = arith.constant 9.99999974E-6 : f32
    %149 = vector.broadcast %cst_51 : f32 to vector<16x1xf32>
    %150 = arith.addf %146, %149 : vector<16x1xf32>
    %151 = math.rsqrt %150 : vector<16x1xf32>
    %152 = vector.broadcast %151 : vector<16x1xf32> to vector<16x32xf32>
    %153 = arith.mulf %148, %152 : vector<16x32xf32>
    %154 = vector.broadcast %134 : vector<1x32xf32> to vector<16x32xf32>
    %155 = arith.mulf %153, %154 : vector<16x32xf32>
    %156 = vector.broadcast %135 : vector<1x32xf32> to vector<16x32xf32>
    %157 = arith.addf %155, %156 : vector<16x32xf32>
    %158 = vector.extract_strided_slice %36 {offsets = [1, 0, 0], sizes = [1, 32, 32], strides = [1, 1, 1]} : vector<3x32x32xf32> to vector<1x32x32xf32>
    %159 = vector.shape_cast %158 : vector<1x32x32xf32> to vector<32x32xf32>
    %cst_52 = arith.constant dense<0.000000e+00> : vector<16x32xf32>
    %160 = tpu.matmul %157, %159, %cst_52 {dimension_numbers = #tpu.dot_dimension_numbers<[1], [0], [0], [1], [0, 0, 1, 1], [], []>} : vector<16x32xf32>, vector<32x32xf32>, vector<16x32xf32> -> vector<16x32xf32>
    %161 = vector.extract_strided_slice %38 {offsets = [3, 0], sizes = [1, 32], strides = [1, 1]} : vector<7x32xf32> to vector<1x32xf32>
    %162 = vector.broadcast %161 : vector<1x32xf32> to vector<16x32xf32>
    %163 = arith.addf %160, %162 : vector<16x32xf32>
    %cst_53 = arith.constant 0.000000e+00 : f32
    %164 = vector.broadcast %cst_53 : f32 to vector<16x32xf32>
    %165 = arith.maximumf %163, %164 : vector<16x32xf32>
    %166 = vector.extract_strided_slice %36 {offsets = [2, 0, 0], sizes = [1, 32, 32], strides = [1, 1, 1]} : vector<3x32x32xf32> to vector<1x32x32xf32>
    %167 = vector.shape_cast %166 : vector<1x32x32xf32> to vector<32x32xf32>
    %cst_54 = arith.constant dense<0.000000e+00> : vector<16x32xf32>
    %168 = tpu.matmul %165, %167, %cst_54 {dimension_numbers = #tpu.dot_dimension_numbers<[1], [0], [0], [1], [0, 0, 1, 1], [], []>} : vector<16x32xf32>, vector<32x32xf32>, vector<16x32xf32> -> vector<16x32xf32>
    %169 = vector.extract_strided_slice %38 {offsets = [4, 0], sizes = [1, 32], strides = [1, 1]} : vector<7x32xf32> to vector<1x32xf32>
    %170 = vector.broadcast %169 : vector<1x32xf32> to vector<16x32xf32>
    %171 = arith.addf %168, %170 : vector<16x32xf32>
    %172 = arith.addf %157, %171 : vector<16x32xf32>
    %173 = vector.extract_strided_slice %38 {offsets = [5, 0], sizes = [1, 32], strides = [1, 1]} : vector<7x32xf32> to vector<1x32xf32>
    %174 = vector.extract_strided_slice %38 {offsets = [6, 0], sizes = [1, 32], strides = [1, 1]} : vector<7x32xf32> to vector<1x32xf32>
    %cst_55 = arith.constant dense<0.000000e+00> : vector<16xf32>
    %175 = vector.multi_reduction <add>, %172, %cst_55 [1] : vector<16x32xf32> to vector<16xf32>
    %176 = vector.shape_cast %175 : vector<16xf32> to vector<16x1xf32>
    %cst_56 = arith.constant 3.200000e+01 : f32
    %177 = vector.broadcast %cst_56 : f32 to vector<16x1xf32>
    %178 = arith.divf %176, %177 : vector<16x1xf32>
    %179 = vector.broadcast %178 : vector<16x1xf32> to vector<16x32xf32>
    %180 = arith.subf %172, %179 : vector<16x32xf32>
    %181 = arith.mulf %180, %180 : vector<16x32xf32>
    %cst_57 = arith.constant dense<0.000000e+00> : vector<16xf32>
    %182 = vector.multi_reduction <add>, %181, %cst_57 [1] : vector<16x32xf32> to vector<16xf32>
    %183 = vector.shape_cast %182 : vector<16xf32> to vector<16x1xf32>
    %cst_58 = arith.constant 3.200000e+01 : f32
    %184 = vector.broadcast %cst_58 : f32 to vector<16x1xf32>
    %185 = arith.divf %183, %184 : vector<16x1xf32>
    %186 = vector.broadcast %178 : vector<16x1xf32> to vector<16x32xf32>
    %187 = arith.subf %172, %186 : vector<16x32xf32>
    %cst_59 = arith.constant 9.99999974E-6 : f32
    %188 = vector.broadcast %cst_59 : f32 to vector<16x1xf32>
    %189 = arith.addf %185, %188 : vector<16x1xf32>
    %190 = math.rsqrt %189 : vector<16x1xf32>
    %191 = vector.broadcast %190 : vector<16x1xf32> to vector<16x32xf32>
    %192 = arith.mulf %187, %191 : vector<16x32xf32>
    %193 = vector.broadcast %173 : vector<1x32xf32> to vector<16x32xf32>
    %194 = arith.mulf %192, %193 : vector<16x32xf32>
    %195 = vector.broadcast %174 : vector<1x32xf32> to vector<16x32xf32>
    %196 = arith.addf %194, %195 : vector<16x32xf32>
    %c1_60 = arith.constant 1 : index
    %c0_61 = arith.constant 0 : index
    %c0_62 = arith.constant 0 : index
    %197 = vector.load %arg5[%c1_60, %c0_61, %c0_62] : memref<2x32x96xf32, #tpu.memory_space<vmem>>, vector<1x32x96xf32>
    %198 = vector.shape_cast %197 : vector<1x32x96xf32> to vector<32x96xf32>
    %c1_63 = arith.constant 1 : index
    %c0_64 = arith.constant 0 : index
    %199 = vector.load %arg6[%c1_63, %c0_64] : memref<2x96xf32, #tpu.memory_space<vmem>>, vector<1x96xf32>
    %c1_65 = arith.constant 1 : index
    %c0_66 = arith.constant 0 : index
    %c0_67 = arith.constant 0 : index
    %c0_68 = arith.constant 0 : index
    %200 = vector.load %arg7[%c1_65, %c0_66, %c0_67, %c0_68] : memref<2x3x32x32xf32, #tpu.memory_space<vmem>>, vector<1x3x32x32xf32>
    %201 = vector.shape_cast %200 : vector<1x3x32x32xf32> to vector<3x32x32xf32>
    %c1_69 = arith.constant 1 : index
    %c0_70 = arith.constant 0 : index
    %c0_71 = arith.constant 0 : index
    %202 = vector.load %arg8[%c1_69, %c0_70, %c0_71] : memref<2x7x32xf32, #tpu.memory_space<vmem>>, vector<1x7x32xf32>
    %203 = vector.shape_cast %202 : vector<1x7x32xf32> to vector<7x32xf32>
    %cst_72 = arith.constant dense<0.000000e+00> : vector<16x96xf32>
    %204 = tpu.matmul %196, %198, %cst_72 {dimension_numbers = #tpu.dot_dimension_numbers<[1], [0], [0], [1], [0, 0, 1, 1], [], []>} : vector<16x32xf32>, vector<32x96xf32>, vector<16x96xf32> -> vector<16x96xf32>
    %205 = vector.broadcast %199 : vector<1x96xf32> to vector<16x96xf32>
    %206 = arith.addf %204, %205 : vector<16x96xf32>
    %207 = vector.extract_strided_slice %206 {offsets = [0, 0], sizes = [16, 8], strides = [1, 1]} : vector<16x96xf32> to vector<16x8xf32>
    %208 = vector.shape_cast %207 : vector<16x8xf32> to vector<2x8x8xf32>
    %209 = vector.extract_strided_slice %206 {offsets = [0, 32], sizes = [16, 8], strides = [1, 1]} : vector<16x96xf32> to vector<16x8xf32>
    %210 = vector.shape_cast %209 : vector<16x8xf32> to vector<2x8x8xf32>
    %211 = vector.extract_strided_slice %206 {offsets = [0, 64], sizes = [16, 8], strides = [1, 1]} : vector<16x96xf32> to vector<16x8xf32>
    %212 = vector.shape_cast %211 : vector<16x8xf32> to vector<2x8x8xf32>
    "tpu.trace_start"() <{level = 10 : i32, message = "ble,bme->blm"}> : () -> ()
    %cst_73 = arith.constant dense<0.000000e+00> : vector<2x8x8xf32>
    %213 = tpu.matmul %208, %210, %cst_73 {dimension_numbers = #tpu.dot_dimension_numbers<[2], [2], [1], [1], [0, 0, 0, 1, 1, 1], [0], [0]>} : vector<2x8x8xf32>, vector<2x8x8xf32>, vector<2x8x8xf32> -> vector<2x8x8xf32>
    "tpu.trace_stop"() : () -> ()
    %cst_74 = arith.constant 0.353553385 : f32
    %214 = vector.broadcast %cst_74 : f32 to vector<2x8x8xf32>
    %215 = arith.mulf %213, %214 : vector<2x8x8xf32>
    %cst_75 = arith.constant dense<0xFF800000> : vector<2x8xf32>
    %216 = vector.multi_reduction <maximumf>, %215, %cst_75 [2] : vector<2x8x8xf32> to vector<2x8xf32>
    %217 = vector.shape_cast %216 : vector<2x8xf32> to vector<2x8x1xf32>
    %218 = vector.broadcast %217 : vector<2x8x1xf32> to vector<2x8x8xf32>
    %219 = arith.subf %215, %218 : vector<2x8x8xf32>
    %220 = math.exp %219 : vector<2x8x8xf32>
    %cst_76 = arith.constant dense<0.000000e+00> : vector<2x8xf32>
    %221 = vector.multi_reduction <add>, %220, %cst_76 [2] : vector<2x8x8xf32> to vector<2x8xf32>
    %222 = vector.shape_cast %221 : vector<2x8xf32> to vector<2x8x1xf32>
    %223 = tpu.reciprocal %222 {approx = true} : vector<2x8x1xf32> -> vector<2x8x1xf32>
    %224 = vector.broadcast %223 : vector<2x8x1xf32> to vector<2x8x8xf32>
    %225 = arith.mulf %220, %224 : vector<2x8x8xf32>
    "tpu.trace_start"() <{level = 10 : i32, message = "blm,bme->ble"}> : () -> ()
    %cst_77 = arith.constant dense<0.000000e+00> : vector<2x8x8xf32>
    %226 = tpu.matmul %225, %212, %cst_77 {dimension_numbers = #tpu.dot_dimension_numbers<[2], [1], [1], [2], [0, 0, 0, 1, 1, 2], [0], [0]>} : vector<2x8x8xf32>, vector<2x8x8xf32>, vector<2x8x8xf32> -> vector<2x8x8xf32>
    "tpu.trace_stop"() : () -> ()
    %227 = vector.shape_cast %226 : vector<2x8x8xf32> to vector<16x8xf32>
    %228 = vector.extract_strided_slice %206 {offsets = [0, 8], sizes = [16, 8], strides = [1, 1]} : vector<16x96xf32> to vector<16x8xf32>
    %229 = vector.shape_cast %228 : vector<16x8xf32> to vector<2x8x8xf32>
    %230 = vector.extract_strided_slice %206 {offsets = [0, 40], sizes = [16, 8], strides = [1, 1]} : vector<16x96xf32> to vector<16x8xf32>
    %231 = vector.shape_cast %230 : vector<16x8xf32> to vector<2x8x8xf32>
    %232 = vector.extract_strided_slice %206 {offsets = [0, 72], sizes = [16, 8], strides = [1, 1]} : vector<16x96xf32> to vector<16x8xf32>
    %233 = vector.shape_cast %232 : vector<16x8xf32> to vector<2x8x8xf32>
    "tpu.trace_start"() <{level = 10 : i32, message = "ble,bme->blm"}> : () -> ()
    %cst_78 = arith.constant dense<0.000000e+00> : vector<2x8x8xf32>
    %234 = tpu.matmul %229, %231, %cst_78 {dimension_numbers = #tpu.dot_dimension_numbers<[2], [2], [1], [1], [0, 0, 0, 1, 1, 1], [0], [0]>} : vector<2x8x8xf32>, vector<2x8x8xf32>, vector<2x8x8xf32> -> vector<2x8x8xf32>
    "tpu.trace_stop"() : () -> ()
    %cst_79 = arith.constant 0.353553385 : f32
    %235 = vector.broadcast %cst_79 : f32 to vector<2x8x8xf32>
    %236 = arith.mulf %234, %235 : vector<2x8x8xf32>
    %cst_80 = arith.constant dense<0xFF800000> : vector<2x8xf32>
    %237 = vector.multi_reduction <maximumf>, %236, %cst_80 [2] : vector<2x8x8xf32> to vector<2x8xf32>
    %238 = vector.shape_cast %237 : vector<2x8xf32> to vector<2x8x1xf32>
    %239 = vector.broadcast %238 : vector<2x8x1xf32> to vector<2x8x8xf32>
    %240 = arith.subf %236, %239 : vector<2x8x8xf32>
    %241 = math.exp %240 : vector<2x8x8xf32>
    %cst_81 = arith.constant dense<0.000000e+00> : vector<2x8xf32>
    %242 = vector.multi_reduction <add>, %241, %cst_81 [2] : vector<2x8x8xf32> to vector<2x8xf32>
    %243 = vector.shape_cast %242 : vector<2x8xf32> to vector<2x8x1xf32>
    %244 = tpu.reciprocal %243 {approx = true} : vector<2x8x1xf32> -> vector<2x8x1xf32>
    %245 = vector.broadcast %244 : vector<2x8x1xf32> to vector<2x8x8xf32>
    %246 = arith.mulf %241, %245 : vector<2x8x8xf32>
    "tpu.trace_start"() <{level = 10 : i32, message = "blm,bme->ble"}> : () -> ()
    %cst_82 = arith.constant dense<0.000000e+00> : vector<2x8x8xf32>
    %247 = tpu.matmul %246, %233, %cst_82 {dimension_numbers = #tpu.dot_dimension_numbers<[2], [1], [1], [2], [0, 0, 0, 1, 1, 2], [0], [0]>} : vector<2x8x8xf32>, vector<2x8x8xf32>, vector<2x8x8xf32> -> vector<2x8x8xf32>
    "tpu.trace_stop"() : () -> ()
    %248 = vector.shape_cast %247 : vector<2x8x8xf32> to vector<16x8xf32>
    %249 = vector.extract_strided_slice %206 {offsets = [0, 16], sizes = [16, 8], strides = [1, 1]} : vector<16x96xf32> to vector<16x8xf32>
    %250 = vector.shape_cast %249 : vector<16x8xf32> to vector<2x8x8xf32>
    %251 = vector.extract_strided_slice %206 {offsets = [0, 48], sizes = [16, 8], strides = [1, 1]} : vector<16x96xf32> to vector<16x8xf32>
    %252 = vector.shape_cast %251 : vector<16x8xf32> to vector<2x8x8xf32>
    %253 = vector.extract_strided_slice %206 {offsets = [0, 80], sizes = [16, 8], strides = [1, 1]} : vector<16x96xf32> to vector<16x8xf32>
    %254 = vector.shape_cast %253 : vector<16x8xf32> to vector<2x8x8xf32>
    "tpu.trace_start"() <{level = 10 : i32, message = "ble,bme->blm"}> : () -> ()
    %cst_83 = arith.constant dense<0.000000e+00> : vector<2x8x8xf32>
    %255 = tpu.matmul %250, %252, %cst_83 {dimension_numbers = #tpu.dot_dimension_numbers<[2], [2], [1], [1], [0, 0, 0, 1, 1, 1], [0], [0]>} : vector<2x8x8xf32>, vector<2x8x8xf32>, vector<2x8x8xf32> -> vector<2x8x8xf32>
    "tpu.trace_stop"() : () -> ()
    %cst_84 = arith.constant 0.353553385 : f32
    %256 = vector.broadcast %cst_84 : f32 to vector<2x8x8xf32>
    %257 = arith.mulf %255, %256 : vector<2x8x8xf32>
    %cst_85 = arith.constant dense<0xFF800000> : vector<2x8xf32>
    %258 = vector.multi_reduction <maximumf>, %257, %cst_85 [2] : vector<2x8x8xf32> to vector<2x8xf32>
    %259 = vector.shape_cast %258 : vector<2x8xf32> to vector<2x8x1xf32>
    %260 = vector.broadcast %259 : vector<2x8x1xf32> to vector<2x8x8xf32>
    %261 = arith.subf %257, %260 : vector<2x8x8xf32>
    %262 = math.exp %261 : vector<2x8x8xf32>
    %cst_86 = arith.constant dense<0.000000e+00> : vector<2x8xf32>
    %263 = vector.multi_reduction <add>, %262, %cst_86 [2] : vector<2x8x8xf32> to vector<2x8xf32>
    %264 = vector.shape_cast %263 : vector<2x8xf32> to vector<2x8x1xf32>
    %265 = tpu.reciprocal %264 {approx = true} : vector<2x8x1xf32> -> vector<2x8x1xf32>
    %266 = vector.broadcast %265 : vector<2x8x1xf32> to vector<2x8x8xf32>
    %267 = arith.mulf %262, %266 : vector<2x8x8xf32>
    "tpu.trace_start"() <{level = 10 : i32, message = "blm,bme->ble"}> : () -> ()
    %cst_87 = arith.constant dense<0.000000e+00> : vector<2x8x8xf32>
    %268 = tpu.matmul %267, %254, %cst_87 {dimension_numbers = #tpu.dot_dimension_numbers<[2], [1], [1], [2], [0, 0, 0, 1, 1, 2], [0], [0]>} : vector<2x8x8xf32>, vector<2x8x8xf32>, vector<2x8x8xf32> -> vector<2x8x8xf32>
    "tpu.trace_stop"() : () -> ()
    %269 = vector.shape_cast %268 : vector<2x8x8xf32> to vector<16x8xf32>
    %270 = vector.extract_strided_slice %206 {offsets = [0, 24], sizes = [16, 8], strides = [1, 1]} : vector<16x96xf32> to vector<16x8xf32>
    %271 = vector.shape_cast %270 : vector<16x8xf32> to vector<2x8x8xf32>
    %272 = vector.extract_strided_slice %206 {offsets = [0, 56], sizes = [16, 8], strides = [1, 1]} : vector<16x96xf32> to vector<16x8xf32>
    %273 = vector.shape_cast %272 : vector<16x8xf32> to vector<2x8x8xf32>
    %274 = vector.extract_strided_slice %206 {offsets = [0, 88], sizes = [16, 8], strides = [1, 1]} : vector<16x96xf32> to vector<16x8xf32>
    %275 = vector.shape_cast %274 : vector<16x8xf32> to vector<2x8x8xf32>
    "tpu.trace_start"() <{level = 10 : i32, message = "ble,bme->blm"}> : () -> ()
    %cst_88 = arith.constant dense<0.000000e+00> : vector<2x8x8xf32>
    %276 = tpu.matmul %271, %273, %cst_88 {dimension_numbers = #tpu.dot_dimension_numbers<[2], [2], [1], [1], [0, 0, 0, 1, 1, 1], [0], [0]>} : vector<2x8x8xf32>, vector<2x8x8xf32>, vector<2x8x8xf32> -> vector<2x8x8xf32>
    "tpu.trace_stop"() : () -> ()
    %cst_89 = arith.constant 0.353553385 : f32
    %277 = vector.broadcast %cst_89 : f32 to vector<2x8x8xf32>
    %278 = arith.mulf %276, %277 : vector<2x8x8xf32>
    %cst_90 = arith.constant dense<0xFF800000> : vector<2x8xf32>
    %279 = vector.multi_reduction <maximumf>, %278, %cst_90 [2] : vector<2x8x8xf32> to vector<2x8xf32>
    %280 = vector.shape_cast %279 : vector<2x8xf32> to vector<2x8x1xf32>
    %281 = vector.broadcast %280 : vector<2x8x1xf32> to vector<2x8x8xf32>
    %282 = arith.subf %278, %281 : vector<2x8x8xf32>
    %283 = math.exp %282 : vector<2x8x8xf32>
    %cst_91 = arith.constant dense<0.000000e+00> : vector<2x8xf32>
    %284 = vector.multi_reduction <add>, %283, %cst_91 [2] : vector<2x8x8xf32> to vector<2x8xf32>
    %285 = vector.shape_cast %284 : vector<2x8xf32> to vector<2x8x1xf32>
    %286 = tpu.reciprocal %285 {approx = true} : vector<2x8x1xf32> -> vector<2x8x1xf32>
    %287 = vector.broadcast %286 : vector<2x8x1xf32> to vector<2x8x8xf32>
    %288 = arith.mulf %283, %287 : vector<2x8x8xf32>
    "tpu.trace_start"() <{level = 10 : i32, message = "blm,bme->ble"}> : () -> ()
    %cst_92 = arith.constant dense<0.000000e+00> : vector<2x8x8xf32>
    %289 = tpu.matmul %288, %275, %cst_92 {dimension_numbers = #tpu.dot_dimension_numbers<[2], [1], [1], [2], [0, 0, 0, 1, 1, 2], [0], [0]>} : vector<2x8x8xf32>, vector<2x8x8xf32>, vector<2x8x8xf32> -> vector<2x8x8xf32>
    "tpu.trace_stop"() : () -> ()
    %290 = vector.shape_cast %289 : vector<2x8x8xf32> to vector<16x8xf32>
    %291 = tpu.concatenate %227, %248, %269, %290 in 1 : vector<16x8xf32>, vector<16x8xf32>, vector<16x8xf32>, vector<16x8xf32> -> vector<16x32xf32>
    %292 = vector.extract_strided_slice %201 {offsets = [0, 0, 0], sizes = [1, 32, 32], strides = [1, 1, 1]} : vector<3x32x32xf32> to vector<1x32x32xf32>
    %293 = vector.shape_cast %292 : vector<1x32x32xf32> to vector<32x32xf32>
    %cst_93 = arith.constant dense<0.000000e+00> : vector<16x32xf32>
    %294 = tpu.matmul %291, %293, %cst_93 {dimension_numbers = #tpu.dot_dimension_numbers<[1], [0], [0], [1], [0, 0, 1, 1], [], []>} : vector<16x32xf32>, vector<32x32xf32>, vector<16x32xf32> -> vector<16x32xf32>
    %295 = vector.extract_strided_slice %203 {offsets = [0, 0], sizes = [1, 32], strides = [1, 1]} : vector<7x32xf32> to vector<1x32xf32>
    %296 = vector.broadcast %295 : vector<1x32xf32> to vector<16x32xf32>
    %297 = arith.addf %294, %296 : vector<16x32xf32>
    %298 = arith.addf %196, %297 : vector<16x32xf32>
    %299 = vector.extract_strided_slice %203 {offsets = [1, 0], sizes = [1, 32], strides = [1, 1]} : vector<7x32xf32> to vector<1x32xf32>
    %300 = vector.extract_strided_slice %203 {offsets = [2, 0], sizes = [1, 32], strides = [1, 1]} : vector<7x32xf32> to vector<1x32xf32>
    %cst_94 = arith.constant dense<0.000000e+00> : vector<16xf32>
    %301 = vector.multi_reduction <add>, %298, %cst_94 [1] : vector<16x32xf32> to vector<16xf32>
    %302 = vector.shape_cast %301 : vector<16xf32> to vector<16x1xf32>
    %cst_95 = arith.constant 3.200000e+01 : f32
    %303 = vector.broadcast %cst_95 : f32 to vector<16x1xf32>
    %304 = arith.divf %302, %303 : vector<16x1xf32>
    %305 = vector.broadcast %304 : vector<16x1xf32> to vector<16x32xf32>
    %306 = arith.subf %298, %305 : vector<16x32xf32>
    %307 = arith.mulf %306, %306 : vector<16x32xf32>
    %cst_96 = arith.constant dense<0.000000e+00> : vector<16xf32>
    %308 = vector.multi_reduction <add>, %307, %cst_96 [1] : vector<16x32xf32> to vector<16xf32>
    %309 = vector.shape_cast %308 : vector<16xf32> to vector<16x1xf32>
    %cst_97 = arith.constant 3.200000e+01 : f32
    %310 = vector.broadcast %cst_97 : f32 to vector<16x1xf32>
    %311 = arith.divf %309, %310 : vector<16x1xf32>
    %312 = vector.broadcast %304 : vector<16x1xf32> to vector<16x32xf32>
    %313 = arith.subf %298, %312 : vector<16x32xf32>
    %cst_98 = arith.constant 9.99999974E-6 : f32
    %314 = vector.broadcast %cst_98 : f32 to vector<16x1xf32>
    %315 = arith.addf %311, %314 : vector<16x1xf32>
    %316 = math.rsqrt %315 : vector<16x1xf32>
    %317 = vector.broadcast %316 : vector<16x1xf32> to vector<16x32xf32>
    %318 = arith.mulf %313, %317 : vector<16x32xf32>
    %319 = vector.broadcast %299 : vector<1x32xf32> to vector<16x32xf32>
    %320 = arith.mulf %318, %319 : vector<16x32xf32>
    %321 = vector.broadcast %300 : vector<1x32xf32> to vector<16x32xf32>
    %322 = arith.addf %320, %321 : vector<16x32xf32>
    %323 = vector.extract_strided_slice %201 {offsets = [1, 0, 0], sizes = [1, 32, 32], strides = [1, 1, 1]} : vector<3x32x32xf32> to vector<1x32x32xf32>
    %324 = vector.shape_cast %323 : vector<1x32x32xf32> to vector<32x32xf32>
    %cst_99 = arith.constant dense<0.000000e+00> : vector<16x32xf32>
    %325 = tpu.matmul %322, %324, %cst_99 {dimension_numbers = #tpu.dot_dimension_numbers<[1], [0], [0], [1], [0, 0, 1, 1], [], []>} : vector<16x32xf32>, vector<32x32xf32>, vector<16x32xf32> -> vector<16x32xf32>
    %326 = vector.extract_strided_slice %203 {offsets = [3, 0], sizes = [1, 32], strides = [1, 1]} : vector<7x32xf32> to vector<1x32xf32>
    %327 = vector.broadcast %326 : vector<1x32xf32> to vector<16x32xf32>
    %328 = arith.addf %325, %327 : vector<16x32xf32>
    %cst_100 = arith.constant 0.000000e+00 : f32
    %329 = vector.broadcast %cst_100 : f32 to vector<16x32xf32>
    %330 = arith.maximumf %328, %329 : vector<16x32xf32>
    %331 = vector.extract_strided_slice %201 {offsets = [2, 0, 0], sizes = [1, 32, 32], strides = [1, 1, 1]} : vector<3x32x32xf32> to vector<1x32x32xf32>
    %332 = vector.shape_cast %331 : vector<1x32x32xf32> to vector<32x32xf32>
    %cst_101 = arith.constant dense<0.000000e+00> : vector<16x32xf32>
    %333 = tpu.matmul %330, %332, %cst_101 {dimension_numbers = #tpu.dot_dimension_numbers<[1], [0], [0], [1], [0, 0, 1, 1], [], []>} : vector<16x32xf32>, vector<32x32xf32>, vector<16x32xf32> -> vector<16x32xf32>
    %334 = vector.extract_strided_slice %203 {offsets = [4, 0], sizes = [1, 32], strides = [1, 1]} : vector<7x32xf32> to vector<1x32xf32>
    %335 = vector.broadcast %334 : vector<1x32xf32> to vector<16x32xf32>
    %336 = arith.addf %333, %335 : vector<16x32xf32>
    %337 = arith.addf %322, %336 : vector<16x32xf32>
    %338 = vector.extract_strided_slice %203 {offsets = [5, 0], sizes = [1, 32], strides = [1, 1]} : vector<7x32xf32> to vector<1x32xf32>
    %339 = vector.extract_strided_slice %203 {offsets = [6, 0], sizes = [1, 32], strides = [1, 1]} : vector<7x32xf32> to vector<1x32xf32>
    %cst_102 = arith.constant dense<0.000000e+00> : vector<16xf32>
    %340 = vector.multi_reduction <add>, %337, %cst_102 [1] : vector<16x32xf32> to vector<16xf32>
    %341 = vector.shape_cast %340 : vector<16xf32> to vector<16x1xf32>
    %cst_103 = arith.constant 3.200000e+01 : f32
    %342 = vector.broadcast %cst_103 : f32 to vector<16x1xf32>
    %343 = arith.divf %341, %342 : vector<16x1xf32>
    %344 = vector.broadcast %343 : vector<16x1xf32> to vector<16x32xf32>
    %345 = arith.subf %337, %344 : vector<16x32xf32>
    %346 = arith.mulf %345, %345 : vector<16x32xf32>
    %cst_104 = arith.constant dense<0.000000e+00> : vector<16xf32>
    %347 = vector.multi_reduction <add>, %346, %cst_104 [1] : vector<16x32xf32> to vector<16xf32>
    %348 = vector.shape_cast %347 : vector<16xf32> to vector<16x1xf32>
    %cst_105 = arith.constant 3.200000e+01 : f32
    %349 = vector.broadcast %cst_105 : f32 to vector<16x1xf32>
    %350 = arith.divf %348, %349 : vector<16x1xf32>
    %351 = vector.broadcast %343 : vector<16x1xf32> to vector<16x32xf32>
    %352 = arith.subf %337, %351 : vector<16x32xf32>
    %cst_106 = arith.constant 9.99999974E-6 : f32
    %353 = vector.broadcast %cst_106 : f32 to vector<16x1xf32>
    %354 = arith.addf %350, %353 : vector<16x1xf32>
    %355 = math.rsqrt %354 : vector<16x1xf32>
    %356 = vector.broadcast %355 : vector<16x1xf32> to vector<16x32xf32>
    %357 = arith.mulf %352, %356 : vector<16x32xf32>
    %358 = vector.broadcast %338 : vector<1x32xf32> to vector<16x32xf32>
    %359 = arith.mulf %357, %358 : vector<16x32xf32>
    %360 = vector.broadcast %339 : vector<1x32xf32> to vector<16x32xf32>
    %361 = arith.addf %359, %360 : vector<16x32xf32>
    %362 = vector.shape_cast %361 : vector<16x32xf32> to vector<2x8x32xf32>
    %cst_107 = arith.constant dense<0.000000e+00> : vector<2x8xf32>
    %363 = vector.multi_reduction <add>, %362, %cst_107 [2] : vector<2x8x32xf32> to vector<2x8xf32>
    %cst_108 = arith.constant 3.200000e+01 : f32
    %364 = vector.broadcast %cst_108 : f32 to vector<2x8xf32>
    %365 = arith.divf %363, %364 : vector<2x8xf32>
    %cst_109 = arith.constant dense<0xFF800000> : vector<2xf32>
    %366 = vector.multi_reduction <maximumf>, %365, %cst_109 [1] : vector<2x8xf32> to vector<2xf32>
    %367 = vector.shape_cast %366 : vector<2xf32> to vector<2x1xf32>
    %368 = vector.broadcast %367 : vector<2x1xf32> to vector<2x8xf32>
    %369 = arith.subf %365, %368 : vector<2x8xf32>
    %370 = math.exp %369 : vector<2x8xf32>
    %cst_110 = arith.constant dense<0.000000e+00> : vector<2xf32>
    %371 = vector.multi_reduction <add>, %370, %cst_110 [1] : vector<2x8xf32> to vector<2xf32>
    %372 = vector.shape_cast %371 : vector<2xf32> to vector<2x1xf32>
    %373 = tpu.reciprocal %372 {approx = true} : vector<2x1xf32> -> vector<2x1xf32>
    %374 = vector.broadcast %373 : vector<2x1xf32> to vector<2x8xf32>
    %375 = arith.mulf %370, %374 : vector<2x8xf32>
    %376 = vector.shape_cast %375 : vector<2x8xf32> to vector<2x8x1xf32>
    %377 = vector.broadcast %376 : vector<2x8x1xf32> to vector<2x8x32xf32>
    %378 = arith.mulf %362, %377 : vector<2x8x32xf32>
    %cst_111 = arith.constant dense<0.000000e+00> : vector<2x32xf32>
    %379 = vector.multi_reduction <add>, %378, %cst_111 [1] : vector<2x8x32xf32> to vector<2x32xf32>
    %c0_112 = arith.constant 0 : index
    %c0_113 = arith.constant 0 : index
    %380 = vector.load %arg9[%c0_112, %c0_113] : memref<2x32xf32, #tpu.memory_space<vmem>>, vector<2x32xf32>
    tpu.vector_store %arg9[%c0_112, %c0_113], %379 {strides = array<i32>} : memref<2x32xf32, #tpu.memory_space<vmem>>, vector<2x32xf32>,
    return
  }
}

</mosaic_0001>

<bundles_post_ra>
// kernel: transformer_hist_forward.1
= control target key start
LH: loop header
LB: loop body
LE: loop exit
PB: predicated region body
PF: predicated region fallthrough
CT: control target
= control target key end

     0   :  { %14 = vsyncpa [#allocation5], 0  ;;  %s2717_s0 = inlined_call_operand.vmem [shape: f32[2], index: 0, kind: input, shape index: {}]   ;;  %s2718_s1 = inlined_call_operand.vmem [shape: f32[16,4], index: 1, kind: input, shape index: {}]   ;;  %s2719_s2 = inlined_call_operand.vmem [shape: f32[4,32], index: 2, kind: input, shape index: {}]   ;;  %s2720_s3 = inlined_call_operand.hbm [shape: f32[2,32,32], index: 3, kind: input, shape index: {}]   ;;  %s2721_s4 = inlined_call_operand.vmem [shape: f32[3,32], index: 4, kind: input, shape index: {}]   ;;  %s2722_s5 = inlined_call_operand.hbm [shape: f32[2,32,96], index: 5, kind: input, shape index: {}]   ;;  %s2723_s6 = inlined_call_operand.vmem [shape: f32[2,96], index: 6, kind: input, shape index: {}]   ;;  %s2724_s7 = inlined_call_operand.hbm [shape: f32[2,3,32,32], index: 7, kind: input, shape index: {}]   ;;  %s2725_s8 = inlined_call_operand.vmem [shape: f32[2,7,32], index: 8, kind: input, shape index: {}]   ;;  %s2726_s9 = inlined_call_operand.hbm [shape: f32[2,32], index: 9, kind: output, shape index: {}]  }
   0x1   :  { %15 = vsyncpa [#allocation3], 0 }
   0x2   :  { %16 = vsyncpa [#allocation8], 0 }
   0x3   :  { %17 = vsyncpa [#allocation4], 0  ;;  %s50_s11 = sshll.u32 %s2722_s5, 4  ;;  %s2274_s12 = smov [#allocation7]   ;;  %s51_s11 = int_to_ptr.hbm [resolvable:$true] %s50_s11 }
   0x4   :  { %s52_s13 = sshll.u32 %s2274_s12, 4  ;;  %s23_s16 = sshll.u32 %s2717_s0, 4  ;;  %s53_s13 = int_to_ptr.vmem [resolvable:$true] %s52_s13  ;;  %s24_s16 = int_to_ptr.vmem [resolvable:$true] %s23_s16 }
   0x5   :  { %s2275_s17 = smov 128   ;;  %s2276_s18 = smov 8  }
   0x6   :  { %58 = dma.hbm_to_vmem [thread:$0]  %s51_s11, 1024, %s53_s13, [#allocation8], %s2275_s17, %s2275_s17, %s2276_s18  }
   0x7   :  { %s2277_s19 = smov [#allocation2]   ;;  %s35_s22 = sshll.u32 %s2720_s3, 4  ;;  %s36_s22 = int_to_ptr.hbm [resolvable:$true] %s35_s22 }
   0x8   :  { %26 = dma.vmem_to_smem %s24_s16, 16, %s2277_s19, [#allocation5]  }
   0x9   :  { %s2278_s5 = smov [#allocation6]   ;;  %s65_s26 = sshll.u32 %s2724_s7, 4  ;;  %s66_s26 = int_to_ptr.hbm [resolvable:$true] %s65_s26 }
   0xa   :  { %s37_s23 = sshll.u32 %s2278_s5, 4  ;;  %s2279_s0 = smov [#allocation9]   ;;  %s38_s23 = int_to_ptr.vmem [resolvable:$true] %s37_s23 }
   0xb   :  { %43 = dma.hbm_to_vmem [thread:$0]  %s36_s22, 1024, %s38_s23, [#allocation3], %s2275_s17, %s2275_s17, %s2276_s18  }
   0xc   :  { %s67_s27 = sshll.u32 %s2279_s0, 4  ;;  %s68_s27 = int_to_ptr.vmem [resolvable:$true] %s67_s27 }
   0xd   :  { %73 = dma.hbm_to_vmem [thread:$0]  %s66_s26, 3072, %s68_s27, [#allocation8], %s2275_s17, %s2275_s17, %s2276_s18  }
   0xe   :  { %2266 = dma.done.wait [#allocation5], 16  }
   0xf   :  { %2267 = vsyncadd [#allocation5], 4294967280 }
  0x10   :  { %2268 = dma.done.wait [#allocation3], 1024  }
  0x11   :  { %2269 = vsyncadd [#allocation3], 4294966272 }
  0x12   :  { %2270 = dma.done.wait [#allocation8], 4096  }
  0x13   :  { %2271 = vsyncadd [#allocation8], 4294963200 }
  0x14   :  { %92 = sfence }
  0x15   :  { %v104_v0 = vld [vmem:[%s2719_s2] sm:$0xf]  ;;  %vm113_vm0 = vcmask 1043456   ;;  %vm106_vm1 = vcmask 31744   ;;  %v97_v2 = vld [vmem:[#allocation6 + $0x18] sm:$0xff]  ;;  %v103_v3 = vld [vmem:[%s2718_s1 + $0x8] sm:$0xff] }
  0x16   :  { %v102_v1 = vld [vmem:[%s2718_s1] sm:$0xff]  ;;  %1936 = vmatpush.msk.msra.mxu0 %vm113_vm0, %v104_v0  ;;  %168 = vmatpush.msra.mxu1 %v97_v2  ;;  %v96_v4 = vld [vmem:[#allocation6 + $0x10] sm:$0xff]  ;;  %v95_v5 = vld [vmem:[#allocation6 + $0x8] sm:$0xff]  ;;  %s142_s2 = sld [smem:[#allocation2]]  ;;  %vm149_vm3 = vcmask 261120   ;;  %s2280_s14 = smov 80  }
  0x17   :  { %1937 = vmatmul.msk.f32.vlgmr.msra.gmra.mxu0 %vm106_vm1, %v102_v1  ;;  %2009 = vmatpush.msra.mxu3 %v97_v2  ;;  %v94_v6 = vld [vmem:[#allocation6] sm:$0xff]  ;;  %v101_v7 = vld [vmem:[#allocation6 + $0x38] sm:$0xff]  ;;  %v100_v19 = vld [vmem:[#allocation6 + $0x30] sm:$0xff]  ;;  %s1941_s1 = sld [smem:[#allocation2 + $0x1]]  ;;  %s2281_s15 = smov 88   ;;  %vm268_vm7 = vcmask 64512  }
  0x18   :  { %169 = vmatpush.msra.mxu1 %v96_v4  ;;  %206 = vmatpush.msra.mxu2 %v101_v7  ;;  %v93_v8 = vld [vmem:[%s2721_s4] sm:$0x7]  ;;  %v99_v20 = vld [vmem:[#allocation6 + $0x28] sm:$0xff]  ;;  %v220_v22 = vld [vmem:[#allocation7 + $0x18] sm:$0xff]  ;;  %s2282_s16 = smov 96   ;;  %s2283_s17 = smov 120  }
  0x19   :  { %2010 = vmatpush.msra.mxu3 %v96_v4  ;;  %v105_v9 = vperm.slane %v93_v8, 0  ;;  %v98_v21 = vld [vmem:[#allocation6 + $0x20] sm:$0xff]  ;;  %v219_v23 = vld [vmem:[#allocation7 + $0x10] sm:$0xff]  ;;  %v148_v24 = vperm.slane %v93_v8, 1  ;;  %v218_v34 = vld [vmem:[#allocation7 + $0x8] sm:$0xff]  ;;  %v187_v36 = vperm.slane %v93_v8, 2 }
  0x1a   :  { %170 = vmatpush.msra.mxu1 %v95_v5  ;;  %207 = vmatpush.msra.mxu2 %v100_v19  ;;  %v217_v35 = vld [vmem:[#allocation7] sm:$0xff]  ;;  %s2284_s19 = smov 112   ;;  %s2285_s20 = smov 104   ;;  %vm818_vm8 = vcmask 130048   ;;  %vm821_vm9 = vcmask 195584  }
  0x1b   :  { %2011 = vmatpush.msra.mxu3 %v95_v5  ;;  %v2068_v41 = vld [vmem:[%s2723_s6] ss:$0 sm:$0xff]  ;;  %s2286_s21 = smov 72   ;;  %s2287_s22 = smov 64  }
  0x1c   :  { %171 = vmatpush.msra.mxu1 %v94_v6  ;;  %v143_v11 = vstv %s142_s2  ;;  %208 = vmatpush.msra.mxu2 %v99_v20  ;;  %s2288_s5 = smov 48   ;;  %s2289_s23 = smov 56  }
  0x1d   :  { %2012 = vmatpush.msra.mxu3 %v94_v6  ;;  %v182_v26 = vstv %s1941_s1  ;;  %s2290_s24 = smov 40   ;;  %s2291_s25 = smov 16  }
  0x1e   :  { %209 = vmatpush.msra.mxu2 %v98_v21  ;;  %s2292_s26 = smov 24   ;;  %s1924_s10 = sshll.u32 %s2726_s9, 4  ;;  %s1925_s10 = int_to_ptr.hbm [resolvable:$true] %s1924_s10 }
  0x1f   :  { %1938 = vmatmul.msk.f32.gmra.mxu0 %vm106_vm1, %v103_v3  ;;  %254 = vmatpush.msrb.mxu3 %v220_v22 }
  0x21   :  { %255 = vmatpush.msrb.mxu3 %v219_v23 }
  0x23   :  { %256 = vmatpush.msrb.mxu3 %v218_v34 }
  0x25   :  { %257 = vmatpush.msrb.mxu3 %v217_v35 }
  0x94   :  { %v134_v10 = vpop.f32.mrf.mxu0 }
  0x95   :  { %v135_v12 = vadd.f32 %v134_v10, %v105_v9 }
  0x97   :  { %v144_v13 = vmul.f32 %v143_v11, %v135_v12  ;;  %vm140_vm2 = vcmp.ge.f32.partialorder %v135_v12, 0.0 }
  0x99   :  { %v146_v14 = vsel %vm140_vm2, %v135_v12, %v144_v13 }
  0x9a   :  { %1939 = vmatmul.msk.f32.vlgmr.msra.gmra.mxu1 %vm149_vm3, %v146_v14 }
  0x9c   :  { %v137_v15 = vpop.f32.mrf.mxu0 }
  0x9d   :  { %v138_v16 = vadd.f32 %v137_v15, %v105_v9 }
  0x9f   :  { %v145_v17 = vmul.f32 %v143_v11, %v138_v16  ;;  %vm141_vm4 = vcmp.ge.f32.partialorder %v138_v16, 0.0 }
  0xa1   :  { %v147_v18 = vsel %vm141_vm4, %v138_v16, %v145_v17 }
  0xa2   :  { %1940 = vmatmul.msk.f32.vlgmr.msra.gmra.mxu3 %vm149_vm3, %v147_v18 }
 0x117   :  { %v173_v25 = vpop.f32.mrf.mxu1 }
 0x118   :  { %v174_v27 = vadd.f32 %v173_v25, %v148_v24 }
 0x11a   :  { %v183_v28 = vmul.f32 %v182_v26, %v174_v27  ;;  %vm179_vm5 = vcmp.ge.f32.partialorder %v174_v27, 0.0 }
 0x11c   :  { %v185_v29 = vsel %vm179_vm5, %v174_v27, %v183_v28 }
 0x11d   :  { %1942 = vmatmul.msk.f32.vlgmr.msra.gmra.mxu2 %vm149_vm3, %v185_v29 }
 0x125   :  { %v176_v30 = vpop.f32.mrf.mxu3 }
 0x126   :  { %v177_v31 = vadd.f32 %v176_v30, %v148_v24 }
 0x128   :  { %v184_v32 = vmul.f32 %v182_v26, %v177_v31  ;;  %vm180_vm6 = vcmp.ge.f32.partialorder %v177_v31, 0.0 }
 0x12a   :  { %v186_v33 = vsel %vm180_vm6, %v177_v31, %v184_v32 }
 0x12b   :  { %1943 = vmatmul.msk.f32.gmra.mxu2 %vm149_vm3, %v186_v33 }
 0x1a0   :  { %v211_v37 = vpop.f32.mrf.mxu2 }
 0x1a1   :  { %v2377_v38 = vadd.f32 %v211_v37, %v187_v36 }
 0x1a3   :  { %1944 = vmatmul.msk.f32.vlgmr.msrb.gmra.mxu3 %vm149_vm3, %v2377_v38 }
 0x1ae   :  { %v214_v39 = vpop.f32.mrf.mxu2 }
 0x1af   :  { %v2381_v40 = vadd.f32 %v214_v39, %v187_v36 }
 0x1b1   :  { %1945 = vmatmul.msk.f32.gmra.mxu3 %vm149_vm3, %v2381_v40 }
 0x226   :  { %v259_v42 = vpop.f32.mrf.mxu3 }
 0x227   :  { %v2388_v43 = vadd.f32 %v2068_v41, %v259_v42 }
 0x229   :  { %530 = vrot.lane.b32.xlu2 %v2388_v43, %s2280_s14  ;;  %398 = vrot.lane.b32.xlu1 %v2388_v43, %s2281_s15 }
 0x22a   :  { %266 = vrot.lane.b32.xlu0 %v2388_v43, %s2282_s16 }
 0x231   :  { %396 = vrot.lane.b32.xlu1 %v2388_v43, %s2283_s17 }
 0x234   :  { %v262_v44 = vpop.f32.mrf.mxu3 }
 0x235   :  { %v2398_v45 = vadd.f32 %v2068_v41, %v262_v44 }
 0x237   :  { %426 = vrot.lane.b32.xlu2 %v2398_v45, %s2281_s15  ;;  %294 = vrot.lane.b32.xlu0 %v2398_v45, %s2282_s16 }
 0x239   :  { %528 = vrot.lane.b32.xlu1 %v2388_v43, %s2284_s19 }
 0x23f   :  { %558 = vrot.lane.b32.xlu2 %v2398_v45, %s2280_s14  ;;  %424 = vrot.lane.b32.xlu0 %v2398_v45, %s2283_s17 }
 0x241   :  { %556 = vrot.lane.b32.xlu1 %v2398_v45, %s2284_s19 }
 0x247   :  { %660 = vrot.lane.b32.xlu2 %v2388_v43, %s2285_s20  ;;  %662 = vrot.lane.b32.xlu0 %v2388_v43, %s2286_s21 }
 0x249   :  { %688 = vrot.lane.b32.xlu1 %v2398_v45, %s2285_s20 }
 0x24f   :  { %690 = vrot.lane.b32.xlu0 %v2398_v45, %s2286_s21 }
 0x283   :  { %v531_v46 = vpop.permute.xlu2 %530 }
 0x291   :  { %v427_v49 = vpop.permute.xlu2 %426 }
 0x299   :  { %v559_v52 = vpop.permute.xlu2 %558 }
 0x29b   :  { %v399_v47 = vpop.permute.xlu1 %398 }
 0x29c   :  { %v267_v48 = vpop.permute.xlu0 %266 }
 0x29d   :  { %1946 = vmatpush.xpose.msk.msrb.mxu0 %vm268_vm7, %v267_v48 }
 0x2a0   :  { %1947 = vmatmul.msk.f32.vlgmr.msrb.gmra.mxu0 %vm268_vm7, %v2388_v43 }
 0x2a1   :  { %1952 = vmatpush.xpose.msk.msra.mxu0 %vm268_vm7, %v399_v47  ;;  %v661_v57 = vpop.permute.xlu2 %660  ;;  %v2035_v47 = vpack.i.bf16 %v2398_v45, %v2388_v43 }
 0x2a3   :  { %v397_v50 = vpop.permute.xlu1 %396 }
 0x2a5   :  { %1958 = vmatpush.xpose.msk.msrb.mxu0 %vm268_vm7, %v531_v46 }
 0x2a8   :  { %1953 = vmatmul.msk.f32.vlgmr.msra.gmra.mxu0 %vm268_vm7, %v397_v50 }
 0x2a9   :  { %v295_v51 = vpop.permute.xlu0 %294 }
 0x2aa   :  { %1948 = vmatpush.xpose.msk.msrb.mxu1 %vm268_vm7, %v295_v51 }
 0x2ab   :  { %v529_v53 = vpop.permute.xlu1 %528 }
 0x2ad   :  { %1949 = vmatmul.msk.f32.vlgmr.msrb.gmra.mxu1 %vm268_vm7, %v2398_v45 }
 0x2ae   :  { %1954 = vmatpush.xpose.msk.msra.mxu1 %vm268_vm7, %v427_v49 }
 0x2b0   :  { %1959 = vmatmul.msk.f32.vlgmr.msrb.gmra.mxu0 %vm268_vm7, %v529_v53 }
 0x2b1   :  { %v425_v54 = vpop.permute.xlu0 %424 }
 0x2b2   :  { %1960 = vmatpush.xpose.msk.msrb.mxu1 %vm268_vm7, %v559_v52 }
 0x2b3   :  { %v557_v56 = vpop.permute.xlu1 %556 }
 0x2b5   :  { %1955 = vmatmul.msk.f32.vlgmr.msra.gmra.mxu1 %vm268_vm7, %v425_v54 }
 0x2b9   :  { %v663_v55 = vpop.permute.xlu0 %662 }
 0x2ba   :  { %1964 = vmatpush.xpose.msk.msra.mxu0 %vm268_vm7, %v663_v55 }
 0x2bb   :  { %v689_v59 = vpop.permute.xlu1 %688 }
 0x2bd   :  { %1961 = vmatmul.msk.f32.vlgmr.msrb.gmra.mxu1 %vm268_vm7, %v557_v56  ;;  %1965 = vmatmul.msk.f32.vlgmr.msra.gmra.mxu0 %vm268_vm7, %v661_v57 }
 0x2c1   :  { %v691_v58 = vpop.permute.xlu0 %690 }
 0x2c2   :  { %1966 = vmatpush.xpose.msk.msra.mxu1 %vm268_vm7, %v691_v58 }
 0x2c5   :  { %1967 = vmatmul.msk.f32.vlgmr.msra.gmra.mxu1 %vm268_vm7, %v689_v59 }
 0x31d   :  { %v290_v60 = vpop.f32.mrf.mxu0 }
 0x31e   :  { %v320_v61 = vmul.f32 0.35355338, %v290_v60 }
 0x320   :  { %v322_v62 = vsel %vm268_vm7, %v320_v61, -inf }
 0x321   :  { %323 = vmax.xlane.f32.xlu2 %v322_v62 }
 0x325   :  { %v421_v63 = vpop.f32.mrf.mxu0 }
 0x326   :  { %v452_v0 = vmul.f32 0.35355338, %v421_v63 }
 0x328   :  { %v454_v1 = vsel %vm268_vm7, %v452_v0, -inf }
 0x329   :  { %455 = vmax.xlane.f32.xlu1 %v454_v1 }
 0x32a   :  { %v317_v2 = vpop.f32.mrf.mxu1 }
 0x32b   :  { %v321_v3 = vmul.f32 0.35355338, %v317_v2 }
 0x32d   :  { %v553_v4 = vpop.f32.mrf.mxu0  ;;  %v325_v5 = vsel %vm268_vm7, %v321_v3, -inf }
 0x32e   :  { %v584_v6 = vmul.f32 0.35355338, %v553_v4  ;;  %326 = vmax.xlane.f32.xlu0 %v325_v5 }
 0x330   :  { %v586_v7 = vsel %vm268_vm7, %v584_v6, -inf }
 0x331   :  { %587 = vmax.xlane.f32.xlu2 %v586_v7 }
 0x332   :  { %v449_v8 = vpop.f32.mrf.mxu1 }
 0x333   :  { %v453_v9 = vmul.f32 0.35355338, %v449_v8 }
 0x335   :  { %v457_v10 = vsel %vm268_vm7, %v453_v9, -inf }
 0x339   :  { %458 = vmax.xlane.f32.xlu2 %v457_v10 }
 0x33a   :  { %v581_v11 = vpop.f32.mrf.mxu1  ;;  %v685_v12 = vpop.f32.mrf.mxu0 }
 0x33b   :  { %v585_v13 = vmul.f32 0.35355338, %v581_v11  ;;  %v716_v14 = vmul.f32 0.35355338, %v685_v12 }
 0x33d   :  { %v589_v15 = vsel %vm268_vm7, %v585_v13, -inf  ;;  %v718_v16 = vsel %vm268_vm7, %v716_v14, -inf }
 0x33e   :  { %590 = vmax.xlane.f32.xlu0 %v589_v15  ;;  %719 = vmax.xlane.f32.xlu1 %v718_v16 }
 0x342   :  { %v713_v17 = vpop.f32.mrf.mxu1 }
 0x343   :  { %v717_v18 = vmul.f32 0.35355338, %v713_v17 }
 0x345   :  { %v721_v19 = vsel %vm268_vm7, %v717_v18, -inf }
 0x346   :  { %722 = vmax.xlane.f32.xlu2 %v721_v19 }
 0x394   :  { %v324_v20 = vpop.xlane.xlu2 %323 }
 0x395   :  { %v328_v21 = vsub.f32 %v320_v61, %v324_v20 }
 0x397   :  { %v330_v22 = vmul.f32 1.442695, %v328_v21 }
 0x399   :  { %2070 = vpow2.f32 %v330_v22 }
 0x39c   :  { %v456_v23 = vpop.xlane.xlu1 %455 }
 0x39d   :  { %v460_v24 = vsub.f32 %v452_v0, %v456_v23 }
 0x39f   :  { %v2446_v25 = vpop.eup %2070  ;;  %v462_v26 = vmul.f32 1.442695, %v460_v24 }
 0x3a0   :  { %v334_v27 = vsel %vm268_vm7, %v2446_v25, 0.0 }
 0x3a1   :  { %2072 = vpow2.f32 %v462_v26  ;;  %335 = vadd.xlane.f32.xlu0 %v334_v27  ;;  %v327_v28 = vpop.xlane.xlu0 %326 }
 0x3a2   :  { %v329_v29 = vsub.f32 %v321_v3, %v327_v28 }
 0x3a4   :  { %v332_v30 = vmul.f32 1.442695, %v329_v29  ;;  %v588_v31 = vpop.xlane.xlu2 %587 }
 0x3a5   :  { %v592_v32 = vsub.f32 %v584_v6, %v588_v31 }
 0x3a6   :  { %2074 = vpow2.f32 %v332_v30 }
 0x3a7   :  { %v2450_v33 = vpop.eup %2072  ;;  %v594_v34 = vmul.f32 1.442695, %v592_v32 }
 0x3a8   :  { %v466_v35 = vsel %vm268_vm7, %v2450_v33, 0.0 }
 0x3a9   :  { %2076 = vpow2.f32 %v594_v34  ;;  %467 = vadd.xlane.f32.xlu2 %v466_v35 }
 0x3ac   :  { %v2075_v36 = vpop.eup %2074  ;;  %v459_v37 = vpop.xlane.xlu2 %458 }
 0x3ad   :  { %v461_v39 = vsub.f32 %v453_v9, %v459_v37  ;;  %v337_v41 = vsel %vm268_vm7, %v2075_v36, 0.0 }
 0x3ae   :  { %338 = vadd.xlane.f32.xlu1 %v337_v41 }
 0x3af   :  { %v2455_v42 = vpop.eup %2076  ;;  %v464_v44 = vmul.f32 1.442695, %v461_v39 }
 0x3b0   :  { %v598_v46 = vsel %vm268_vm7, %v2455_v42, 0.0 }
 0x3b1   :  { %2078 = vpow2.f32 %v464_v44  ;;  %599 = vadd.xlane.f32.xlu2 %v598_v46  ;;  %v720_v50 = vpop.xlane.xlu1 %719  ;;  %v591_v54 = vpop.xlane.xlu0 %590  ;;  %v225_v46 = vld [vmem:[#allocation9 + $0x18] sm:$0xff] }
 0x3b2   :  { %v724_v51 = vsub.f32 %v716_v14, %v720_v50  ;;  %v593_v56 = vsub.f32 %v585_v13, %v591_v54  ;;  %843 = vmatpush.msrb.mxu0 %v225_v46 }
 0x3b4   :  { %v726_v52 = vmul.f32 1.442695, %v724_v51  ;;  %v596_v57 = vmul.f32 1.442695, %v593_v56 }
 0x3b5   :  { %2036 = vrot.lane.b32.xlu0 %v2035_v47, %s2287_s22 }
 0x3b6   :  { %2080 = vpow2.f32 %v726_v52 }
 0x3b7   :  { %v2079_v48 = vpop.eup %2078  ;;  %2082 = vpow2.f32 %v596_v57 }
 0x3b8   :  { %v469_v49 = vsel %vm268_vm7, %v2079_v48, 0.0 }
 0x3b9   :  { %470 = vadd.xlane.f32.xlu1 %v469_v49  ;;  %v723_v58 = vpop.xlane.xlu2 %722  ;;  %v222_v49 = vld [vmem:[#allocation9] sm:$0xff] }
 0x3ba   :  { %v725_v59 = vsub.f32 %v717_v18, %v723_v58 }
 0x3bc   :  { %v2465_v53 = vpop.eup %2080  ;;  %v728_v61 = vmul.f32 1.442695, %v725_v59 }
 0x3bd   :  { %v730_v55 = vsel %vm268_vm7, %v2465_v53, 0.0  ;;  %v2083_v60 = vpop.eup %2082 }
 0x3be   :  { %v601_v62 = vsel %vm268_vm7, %v2083_v60, 0.0  ;;  %2084 = vpow2.f32 %v728_v61 }
 0x3c4   :  { %v2470_v63 = vpop.eup %2084 }
 0x3c5   :  { %v733_v0 = vsel %vm268_vm7, %v2470_v63, 0.0 }
 0x3c9   :  { %2046 = vrot.lane.b32.xlu2 %v2035_v47, %s2288_s5 }
 0x3d2   :  { %2041 = vrot.lane.b32.xlu1 %v2035_v47, %s2289_s23  ;;  %v224_v47 = vld [vmem:[#allocation9 + $0x10] sm:$0xff] }
 0x3d3   :  { %844 = vmatpush.msrb.mxu0 %v224_v47 }
 0x3df   :  { %731 = vadd.xlane.f32.xlu0 %v730_v55 }
 0x3f2   :  { %602 = vadd.xlane.f32.xlu2 %v601_v62  ;;  %v2508_v62 = vld [vmem:[%s2725_s8] sm:$0x7f] }
 0x3fc   :  { %734 = vadd.xlane.f32.xlu1 %v733_v0 }
 0x40a   :  { %740 = vrot.lane.b32.xlu2 %v2388_v43, %s2290_s24 }
 0x412   :  { %766 = vrot.lane.b32.xlu2 %v2398_v45, %s2290_s24 }
 0x414   :  { %v336_v1 = vpop.xlane.xlu0 %335 }
 0x415   :  { %2086 = vrcp.f32 %v336_v1 }
 0x41b   :  { %v2087_v3 = vpop.eup %2086 }
 0x41c   :  { %v342_v9 = vmul.f32 %v2087_v3, %v2446_v25  ;;  %v468_v43 = vpop.xlane.xlu2 %467 }
 0x421   :  { %v339_v2 = vpop.xlane.xlu1 %338 }
 0x422   :  { %2088 = vrcp.f32 %v339_v2 }
 0x423   :  { %2090 = vrcp.f32 %v468_v43 }
 0x424   :  { %v600_v45 = vpop.xlane.xlu2 %599 }
 0x427   :  { %v2037_v4 = vpop.permute.xlu0 %2036 }
 0x428   :  { %v2089_v5 = vpop.eup %2088  ;;  %v2039_v6 = vunpack.i.h.bf16 %v2037_v4  ;;  %v2038_v7 = vunpack.i.l.bf16 %v2037_v4 }
 0x429   :  { %v343_v8 = vmul.f32 %v2089_v5, %v2075_v36  ;;  %v2091_v11 = vpop.eup %2090 }
 0x42a   :  { %365 = vmatpush.msrb.mxu2 %v2038_v7  ;;  %391 = vmatpush.msra.mxu3 %v2039_v6  ;;  %v474_v17 = vmul.f32 %v2091_v11, %v2450_v33 }
 0x42b   :  { %1950 = vmatmul.msk.f32.vlgmr.msrb.gmra.mxu2 %vm268_vm7, %v342_v9  ;;  %1951 = vmatmul.msk.f32.vlgmr.msra.gmra.mxu3 %vm268_vm7, %v343_v8  ;;  %v2293_v8 = vmov 32.0  }
 0x42c   :  { %v471_v10 = vpop.xlane.xlu1 %470  ;;  %v2047_v13 = vpop.permute.xlu2 %2046 }
 0x42d   :  { %2092 = vrcp.f32 %v471_v10  ;;  %v2049_v19 = vunpack.i.h.bf16 %v2047_v13  ;;  %v2048_v20 = vunpack.i.l.bf16 %v2047_v13 }
 0x42e   :  { %2094 = vrcp.f32 %v600_v45 }
 0x433   :  { %v2093_v12 = vpop.eup %2092 }
 0x434   :  { %v475_v18 = vmul.f32 %v2093_v12, %v2079_v48  ;;  %v2095_v21 = vpop.eup %2094  ;;  %v223_v48 = vld [vmem:[#allocation9 + $0x8] sm:$0xff] }
 0x435   :  { %v606_v22 = vmul.f32 %v2095_v21, %v2455_v42  ;;  %845 = vmatpush.msrb.mxu0 %v223_v48  ;;  %v229_v21 = vld [vmem:[#allocation9 + $0x38] sm:$0xff] }
 0x436   :  { %932 = vmatpush.msrb.mxu1 %v229_v21  ;;  %v1031_v21 = vld [vmem:[#allocation7 + $0x38] sm:$0xff] }
 0x437   :  { %846 = vmatpush.msrb.mxu0 %v222_v49 }
 0x444   :  { %v2042_v14 = vpop.permute.xlu1 %2041 }
 0x445   :  { %v2044_v15 = vunpack.i.h.bf16 %v2042_v14  ;;  %v2043_v16 = vunpack.i.l.bf16 %v2042_v14 }
 0x447   :  { %497 = vmatpush.msra.mxu2 %v2043_v16  ;;  %523 = vmatpush.msrb.mxu3 %v2044_v15 }
 0x448   :  { %1956 = vmatmul.msk.f32.vlgmr.msra.gmra.mxu2 %vm268_vm7, %v474_v17  ;;  %1957 = vmatmul.msk.f32.vlgmr.msrb.gmra.mxu3 %vm268_vm7, %v475_v18 }
 0x449   :  { %629 = vmatpush.msrb.mxu2 %v2048_v20  ;;  %655 = vmatpush.msra.mxu3 %v2049_v19 }
 0x450   :  { %1962 = vmatmul.msk.f32.vlgmr.msrb.gmra.mxu2 %vm268_vm7, %v606_v22  ;;  %v228_v22 = vld [vmem:[#allocation9 + $0x30] sm:$0xff] }
 0x451   :  { %933 = vmatpush.msrb.mxu1 %v228_v22  ;;  %v1030_v22 = vld [vmem:[#allocation7 + $0x30] sm:$0xff] }
 0x452   :  { %v732_v23 = vpop.xlane.xlu0 %731 }
 0x453   :  { %2096 = vrcp.f32 %v732_v23  ;;  %v227_v23 = vld [vmem:[#allocation9 + $0x28] sm:$0xff] }
 0x454   :  { %934 = vmatpush.msrb.mxu1 %v227_v23  ;;  %v1029_v23 = vld [vmem:[#allocation7 + $0x28] sm:$0xff] }
 0x459   :  { %v2097_v25 = vpop.eup %2096 }
 0x45a   :  { %v738_v27 = vmul.f32 %v2097_v25, %v2465_v53 }
 0x465   :  { %v603_v24 = vpop.xlane.xlu2 %602 }
 0x466   :  { %2098 = vrcp.f32 %v603_v24  ;;  %v226_v24 = vld [vmem:[#allocation9 + $0x20] sm:$0xff] }
 0x467   :  { %935 = vmatpush.msrb.mxu1 %v226_v24  ;;  %v1028_v24 = vld [vmem:[#allocation7 + $0x20] sm:$0xff] }
 0x46c   :  { %v2099_v26 = vpop.eup %2098 }
 0x46d   :  { %v607_v28 = vmul.f32 %v2099_v26, %v2083_v60  ;;  %v741_v29 = vpop.permute.xlu2 %740 }
 0x46e   :  { %761 = vmatpush.msra.mxu2 %v741_v29 }
 0x46f   :  { %v735_v30 = vpop.xlane.xlu1 %734  ;;  %1963 = vmatmul.msk.f32.vlgmr.msra.gmra.mxu3 %vm268_vm7, %v607_v28  ;;  %1968 = vmatmul.msk.f32.vlgmr.msra.gmra.mxu2 %vm268_vm7, %v738_v27 }
 0x470   :  { %2100 = vrcp.f32 %v735_v30 }
 0x471   :  { %2102 = vrcp.f32 %v2293_v8 }
 0x475   :  { %v767_v31 = vpop.permute.xlu2 %766 }
 0x476   :  { %v2101_v32 = vpop.eup %2100  ;;  %787 = vmatpush.msrb.mxu3 %v767_v31 }
 0x477   :  { %v739_v33 = vmul.f32 %v2101_v32, %v2470_v63  ;;  %v824_v63 = vperm.slane %v2508_v62, 0  ;;  %v2103_v9 = vpop.eup %2102 }
 0x478   :  { %v863_v43 = vmul.f32 32.0, %v2103_v9  ;;  %vm867_vm10 = vweird.f32 %v2103_v9  ;;  %1067 = vmatpush.msra.mxu3 %v1031_v21 }
 0x479   :  { %1969 = vmatmul.msk.f32.vlgmr.msrb.gmra.mxu3 %vm268_vm7, %v739_v33 }
 0x47a   :  { %v864_v45 = vsub.f32 1.0, %v863_v43  ;;  %1068 = vmatpush.msra.mxu3 %v1030_v22 }
 0x47c   :  { %v865_v10 = vmul.f32 %v2103_v9, %v864_v45  ;;  %1069 = vmatpush.msra.mxu3 %v1029_v23 }
 0x47e   :  { %v866_v11 = vadd.f32 %v2103_v9, %v865_v10  ;;  %1070 = vmatpush.msra.mxu3 %v1028_v24 }
 0x480   :  { %v2515_v12 = vsel %vm867_vm10, %v2103_v9, %v866_v11 }
 0x4ae   :  { %v367_v34 = vpop.f32.mrf.mxu2  ;;  %v393_v35 = vpop.f32.mrf.mxu3 }
 0x4cb   :  { %v499_v36 = vpop.f32.mrf.mxu2  ;;  %v525_v37 = vpop.f32.mrf.mxu3 }
 0x4cc   :  { %796 = vrot.lane.b32.xlu1 %v525_v37, %s2276_s18  ;;  %794 = vrot.lane.b32.xlu0 %v499_v36, %s2276_s18  ;;  %v910_v37 = vperm.slane %v2508_v62, 2 }
 0x4d3   :  { %v631_v39 = vpop.f32.mrf.mxu2 }
 0x4d4   :  { %802 = vrot.lane.b32.xlu2 %v631_v39, %s2291_s25 }
 0x4f2   :  { %v763_v41 = vpop.f32.mrf.mxu2  ;;  %v657_v42 = vpop.f32.mrf.mxu3 }
 0x4f3   :  { %810 = vrot.lane.b32.xlu2 %v763_v41, %s2292_s26 }
 0x4fb   :  { %804 = vrot.lane.b32.xlu2 %v657_v42, %s2291_s25  ;;  %v233_v42 = vld [vmem:[#allocation9 + $0x58] sm:$0xff] }
 0x4fc   :  { %v789_v44 = vpop.f32.mrf.mxu3  ;;  %964 = vmatpush.msrb.mxu2 %v233_v42 }
 0x4fd   :  { %812 = vrot.lane.b32.xlu0 %v789_v44, %s2292_s26 }
 0x52e   :  { %v803_v50 = vpop.permute.xlu2 %802 }
 0x53e   :  { %v795_v51 = vpop.permute.xlu0 %794  ;;  %v797_v56 = vpop.permute.xlu1 %796 }
 0x53f   :  { %v816_v52 = vsel %vm268_vm7, %v367_v34, %v795_v51  ;;  %v817_v58 = vsel %vm268_vm7, %v393_v35, %v797_v56  ;;  %v907_v34 = vperm.slane %v2508_v62, 1 }
 0x540   :  { %v819_v53 = vsel %vm818_vm8, %v816_v52, %v803_v50 }
 0x54d   :  { %v811_v54 = vpop.permute.xlu2 %810 }
 0x54e   :  { %v822_v55 = vsel %vm821_vm9, %v819_v53, %v811_v54 }
 0x54f   :  { %1970 = vmatmul.msk.f32.vlgmr.msrb.gmra.mxu0 %vm149_vm3, %v822_v55 }
 0x555   :  { %v805_v57 = vpop.permute.xlu2 %804 }
 0x556   :  { %v820_v59 = vsel %vm818_vm8, %v817_v58, %v805_v57  ;;  %v232_v58 = vld [vmem:[#allocation9 + $0x50] sm:$0xff] }
 0x557   :  { %965 = vmatpush.msrb.mxu2 %v232_v58 }
 0x56f   :  { %v813_v60 = vpop.permute.xlu0 %812 }
 0x570   :  { %v823_v61 = vsel %vm821_vm9, %v820_v59, %v813_v60  ;;  %v231_v59 = vld [vmem:[#allocation9 + $0x48] sm:$0xff]  ;;  %v230_v60 = vld [vmem:[#allocation9 + $0x40] sm:$0xff] }
 0x571   :  { %1971 = vmatmul.msk.f32.gmra.mxu0 %vm149_vm3, %v823_v61  ;;  %966 = vmatpush.msrb.mxu2 %v231_v59  ;;  %v913_v61 = vperm.slane %v2508_v62, 3 }
 0x573   :  { %967 = vmatpush.msrb.mxu2 %v230_v60 }
 0x5cc   :  { %v848_v0 = vpop.f32.mrf.mxu0 }
 0x5cd   :  { %v849_v1 = vadd.f32 %v848_v0, %v824_v63 }
 0x5cf   :  { %v854_v2 = vadd.f32 %v849_v1, %v2377_v38 }
 0x5d1   :  { %v856_v3 = vsel %vm149_vm3, %v854_v2, 0.0 }
 0x5d2   :  { %857 = vadd.xlane.f32.xlu2 %v856_v3 }
 0x5ee   :  { %v851_v4 = vpop.f32.mrf.mxu0 }
 0x5ef   :  { %v852_v5 = vadd.f32 %v851_v4, %v824_v63 }
 0x5f1   :  { %v855_v6 = vadd.f32 %v852_v5, %v2381_v40  ;;  %v945_v5 = vperm.slane %v2508_v62, 4 }
 0x5f3   :  { %v859_v7 = vsel %vm149_vm3, %v855_v6, 0.0 }
 0x5f4   :  { %860 = vadd.xlane.f32.xlu0 %v859_v7 }
 0x645   :  { %v858_v38 = vpop.xlane.xlu2 %857 }
 0x646   :  { %v869_v13 = vmul.f32 %v2515_v12, %v858_v38 }
 0x648   :  { %v871_v14 = vsub.f32 %v854_v2, %v869_v13 }
 0x64a   :  { %v873_v15 = vmul.f32 %v871_v14, %v871_v14 }
 0x64c   :  { %v875_v40 = vsel %vm149_vm3, %v873_v15, 0.0 }
 0x64d   :  { %876 = vadd.xlane.f32.xlu1 %v875_v40 }
 0x667   :  { %v861_v16 = vpop.xlane.xlu0 %860 }
 0x668   :  { %v870_v17 = vmul.f32 %v2515_v12, %v861_v16 }
 0x66a   :  { %v872_v18 = vsub.f32 %v855_v6, %v870_v17 }
 0x66c   :  { %v874_v19 = vmul.f32 %v872_v18, %v872_v18 }
 0x66e   :  { %v878_v20 = vsel %vm149_vm3, %v874_v19, 0.0 }
 0x66f   :  { %879 = vadd.xlane.f32.xlu2 %v878_v20 }
 0x6c0   :  { %v877_v25 = vpop.xlane.xlu1 %876 }
 0x6c1   :  { %v881_v26 = vmul.f32 %v877_v25, %v2515_v12 }
 0x6c3   :  { %v883_v27 = vadd.f32 1e-05, %v881_v26 }
 0x6c5   :  { %2104 = vrsqrt.f32 %v883_v27  ;;  %vm891_vm12 = vweird.f32 %v883_v27 }
 0x6cb   :  { %v2105_v28 = vpop.eup %2104 }
 0x6cc   :  { %v886_v29 = vmul.f32 %v2105_v28, %v883_v27  ;;  %vm892_vm11 = vweird.f32 %v2105_v28 }
 0x6cd   :  { %vm893_vm13 = vmor %vm891_vm12, %vm892_vm11 }
 0x6ce   :  { %v887_v30 = vmul.f32 %v2105_v28, %v886_v29 }
 0x6d0   :  { %v888_v31 = vmul.f32 0.5, %v887_v30 }
 0x6d2   :  { %v889_v32 = vsub.f32 1.5, %v888_v31 }
 0x6d4   :  { %v890_v33 = vmul.f32 %v2105_v28, %v889_v32 }
 0x6d6   :  { %v894_v35 = vsel %vm893_vm13, %v2105_v28, %v890_v33 }
 0x6d7   :  { %v905_v36 = vmul.f32 %v894_v35, %v871_v14 }
 0x6d9   :  { %v908_v39 = vmul.f32 %v907_v34, %v905_v36 }
 0x6db   :  { %v911_v41 = vadd.f32 %v910_v37, %v908_v39 }
 0x6dd   :  { %1972 = vmatmul.msk.f32.vlgmr.msrb.gmra.mxu1 %vm149_vm3, %v911_v41 }
 0x6e2   :  { %v880_v44 = vpop.xlane.xlu2 %879 }
 0x6e3   :  { %v882_v46 = vmul.f32 %v880_v44, %v2515_v12 }
 0x6e5   :  { %v884_v47 = vadd.f32 1e-05, %v882_v46 }
 0x6e7   :  { %2106 = vrsqrt.f32 %v884_v47  ;;  %vm901_vm15 = vweird.f32 %v884_v47 }
 0x6ed   :  { %v2107_v48 = vpop.eup %2106 }
 0x6ee   :  { %v896_v49 = vmul.f32 %v2107_v48, %v884_v47  ;;  %vm902_vm14 = vweird.f32 %v2107_v48 }
 0x6ef   :  { %vm903_vm0 = vmor %vm901_vm15, %vm902_vm14 }
 0x6f0   :  { %v897_v50 = vmul.f32 %v2107_v48, %v896_v49 }
 0x6f2   :  { %v898_v51 = vmul.f32 0.5, %v897_v50 }
 0x6f4   :  { %v899_v52 = vsub.f32 1.5, %v898_v51 }
 0x6f6   :  { %v900_v53 = vmul.f32 %v2107_v48, %v899_v52 }
 0x6f8   :  { %v904_v54 = vsel %vm903_vm0, %v2107_v48, %v900_v53 }
 0x6f9   :  { %v906_v55 = vmul.f32 %v904_v54, %v872_v18 }
 0x6fb   :  { %v909_v56 = vmul.f32 %v907_v34, %v906_v55  ;;  %v1021_v34 = vperm.slane %v2508_v62, 5 }
 0x6fd   :  { %v912_v57 = vadd.f32 %v910_v37, %v909_v56  ;;  %v1024_v37 = vperm.slane %v2508_v62, 6  ;;  %v2069_v56 = vld [vmem:[%s2723_s6 + $0x1] ss:$0 sm:$0xff] }
 0x6ff   :  { %1973 = vmatmul.msk.f32.gmra.mxu1 %vm149_vm3, %v912_v57 }
 0x75a   :  { %v937_v63 = vpop.f32.mrf.mxu1 }
 0x75b   :  { %v938_v0 = vadd.f32 %v937_v63, %v913_v61 }
 0x75d   :  { %v943_v1 = vmax.f32 %v938_v0, 0.0 }
 0x75f   :  { %1974 = vmatmul.msk.f32.vlgmr.msrb.gmra.mxu2 %vm149_vm3, %v943_v1 }
 0x77c   :  { %v940_v2 = vpop.f32.mrf.mxu1 }
 0x77d   :  { %v941_v3 = vadd.f32 %v940_v2, %v913_v61 }
 0x77f   :  { %v944_v4 = vmax.f32 %v941_v3, 0.0 }
 0x781   :  { %1975 = vmatmul.msk.f32.gmra.mxu2 %vm149_vm3, %v944_v4 }
 0x7e2   :  { %v969_v6 = vpop.f32.mrf.mxu2 }
 0x7e3   :  { %v970_v7 = vadd.f32 %v969_v6, %v945_v5 }
 0x7e5   :  { %v975_v8 = vadd.f32 %v970_v7, %v911_v41 }
 0x7e7   :  { %v977_v9 = vsel %vm149_vm3, %v975_v8, 0.0 }
 0x7e8   :  { %978 = vadd.xlane.f32.xlu0 %v977_v9 }
 0x804   :  { %v972_v43 = vpop.f32.mrf.mxu2 }
 0x805   :  { %v973_v45 = vadd.f32 %v972_v43, %v945_v5 }
 0x807   :  { %v976_v10 = vadd.f32 %v973_v45, %v912_v57 }
 0x809   :  { %v980_v11 = vsel %vm149_vm3, %v976_v10, 0.0 }
 0x80a   :  { %981 = vadd.xlane.f32.xlu2 %v980_v11 }
 0x85b   :  { %v979_v38 = vpop.xlane.xlu0 %978 }
 0x85c   :  { %v983_v13 = vmul.f32 %v979_v38, %v2515_v12 }
 0x85e   :  { %v985_v14 = vsub.f32 %v975_v8, %v983_v13 }
 0x860   :  { %v987_v15 = vmul.f32 %v985_v14, %v985_v14 }
 0x862   :  { %v989_v40 = vsel %vm149_vm3, %v987_v15, 0.0 }
 0x863   :  { %990 = vadd.xlane.f32.xlu0 %v989_v40 }
 0x87d   :  { %v982_v16 = vpop.xlane.xlu2 %981 }
 0x87e   :  { %v984_v17 = vmul.f32 %v982_v16, %v2515_v12 }
 0x880   :  { %v986_v18 = vsub.f32 %v976_v10, %v984_v17 }
 0x882   :  { %v988_v19 = vmul.f32 %v986_v18, %v986_v18 }
 0x884   :  { %v992_v20 = vsel %vm149_vm3, %v988_v19, 0.0 }
 0x885   :  { %993 = vadd.xlane.f32.xlu1 %v992_v20 }
 0x8d6   :  { %v991_v25 = vpop.xlane.xlu0 %990 }
 0x8d7   :  { %v995_v26 = vmul.f32 %v991_v25, %v2515_v12 }
 0x8d9   :  { %v997_v27 = vadd.f32 1e-05, %v995_v26 }
 0x8db   :  { %2108 = vrsqrt.f32 %v997_v27  ;;  %vm1005_vm2 = vweird.f32 %v997_v27 }
 0x8e1   :  { %v2109_v28 = vpop.eup %2108 }
 0x8e2   :  { %v1000_v29 = vmul.f32 %v2109_v28, %v997_v27  ;;  %vm1006_vm1 = vweird.f32 %v2109_v28 }
 0x8e3   :  { %vm1007_vm4 = vmor %vm1005_vm2, %vm1006_vm1 }
 0x8e4   :  { %v1001_v30 = vmul.f32 %v2109_v28, %v1000_v29 }
 0x8e6   :  { %v1002_v31 = vmul.f32 0.5, %v1001_v30 }
 0x8e8   :  { %v1003_v32 = vsub.f32 1.5, %v1002_v31 }
 0x8ea   :  { %v1004_v33 = vmul.f32 %v2109_v28, %v1003_v32 }
 0x8ec   :  { %v1008_v35 = vsel %vm1007_vm4, %v2109_v28, %v1004_v33 }
 0x8ed   :  { %v1019_v36 = vmul.f32 %v1008_v35, %v985_v14 }
 0x8ef   :  { %v1022_v39 = vmul.f32 %v1021_v34, %v1019_v36 }
 0x8f1   :  { %v2540_v41 = vadd.f32 %v1024_v37, %v1022_v39 }
 0x8f3   :  { %1977 = vmatmul.msk.f32.vlgmr.msra.gmra.mxu3 %vm149_vm3, %v2540_v41 }
 0x8f8   :  { %v994_v42 = vpop.xlane.xlu1 %993 }
 0x8f9   :  { %v996_v44 = vmul.f32 %v994_v42, %v2515_v12 }
 0x8fb   :  { %v998_v46 = vadd.f32 1e-05, %v996_v44 }
 0x8fd   :  { %2110 = vrsqrt.f32 %v998_v46  ;;  %vm1015_vm6 = vweird.f32 %v998_v46 }
 0x903   :  { %v2111_v47 = vpop.eup %2110 }
 0x904   :  { %v1010_v48 = vmul.f32 %v2111_v47, %v998_v46  ;;  %vm1016_vm5 = vweird.f32 %v2111_v47 }
 0x905   :  { %vm1017_vm10 = vmor %vm1015_vm6, %vm1016_vm5  ;;  %vm1844_vm5 = vcmask 1041409   ;;  %vm1847_vm6 = vcmask 58368  }
 0x906   :  { %v1011_v49 = vmul.f32 %v2111_v47, %v1010_v48 }
 0x908   :  { %v1012_v50 = vmul.f32 0.5, %v1011_v49 }
 0x90a   :  { %v1013_v51 = vsub.f32 1.5, %v1012_v50 }
 0x90c   :  { %v1014_v52 = vmul.f32 %v2111_v47, %v1013_v51 }
 0x90e   :  { %v1018_v62 = vsel %vm1017_vm10, %v2111_v47, %v1014_v52  ;;  %vm1915_vm10 = vcmask 254976  }
 0x90f   :  { %v1020_v53 = vmul.f32 %v1018_v62, %v986_v18 }
 0x911   :  { %v1023_v54 = vmul.f32 %v1021_v34, %v1020_v53 }
 0x913   :  { %v2545_v55 = vadd.f32 %v1024_v37, %v1023_v54 }
 0x915   :  { %1978 = vmatmul.msk.f32.gmra.mxu3 %vm149_vm3, %v2545_v55 }
 0x976   :  { %v1072_v57 = vpop.f32.mrf.mxu3 }
 0x977   :  { %v2552_v58 = vadd.f32 %v2069_v56, %v1072_v57 }
 0x979   :  { %1208 = vrot.lane.b32.xlu0 %v2552_v58, %s2283_s17  ;;  %1079 = vrot.lane.b32.xlu2 %v2552_v58, %s2282_s16 }
 0x97a   :  { %1210 = vrot.lane.b32.xlu1 %v2552_v58, %s2281_s15 }
 0x982   :  { %1342 = vrot.lane.b32.xlu1 %v2552_v58, %s2280_s14 }
 0x998   :  { %v1075_v59 = vpop.f32.mrf.mxu3 }
 0x999   :  { %v2562_v60 = vadd.f32 %v2069_v56, %v1075_v59 }
 0x99b   :  { %1370 = vrot.lane.b32.xlu1 %v2562_v60, %s2280_s14  ;;  %1238 = vrot.lane.b32.xlu2 %v2562_v60, %s2281_s15  ;;  %v2050_v46 = vpack.i.bf16 %v2562_v60, %v2552_v58 }
 0x99c   :  { %1106 = vrot.lane.b32.xlu0 %v2562_v60, %s2282_s16 }
 0x9a3   :  { %1472 = vrot.lane.b32.xlu1 %v2552_v58, %s2285_s20  ;;  %1340 = vrot.lane.b32.xlu2 %v2552_v58, %s2284_s19 }
 0x9a4   :  { %1236 = vrot.lane.b32.xlu0 %v2562_v60, %s2283_s17 }
 0x9ab   :  { %1368 = vrot.lane.b32.xlu2 %v2562_v60, %s2284_s19 }
 0x9ac   :  { %1474 = vrot.lane.b32.xlu0 %v2552_v58, %s2286_s21 }
 0x9b3   :  { %1500 = vrot.lane.b32.xlu2 %v2562_v60, %s2285_s20 }
 0x9b4   :  { %1502 = vrot.lane.b32.xlu0 %v2562_v60, %s2286_s21 }
 0x9d3   :  { %v1080_v61 = vpop.permute.xlu2 %1079 }
 0x9d4   :  { %1979 = vmatpush.xpose.msk.msra.mxu0 %vm268_vm7, %v1080_v61 }
 0x9d7   :  { %1980 = vmatmul.msk.f32.vlgmr.msra.gmra.mxu0 %vm268_vm7, %v2552_v58 }
 0x9eb   :  { %v1209_v0 = vpop.permute.xlu0 %1208 }
 0x9ec   :  { %v1211_v63 = vpop.permute.xlu1 %1210 }
 0x9ed   :  { %1985 = vmatpush.xpose.msk.msrb.mxu0 %vm268_vm7, %v1211_v63 }
 0x9f0   :  { %1986 = vmatmul.msk.f32.vlgmr.msrb.gmra.mxu0 %vm268_vm7, %v1209_v0 }
 0x9f4   :  { %v1343_v1 = vpop.permute.xlu1 %1342 }
 0x9f5   :  { %1991 = vmatpush.xpose.msk.msra.mxu0 %vm268_vm7, %v1343_v1  ;;  %v1239_v2 = vpop.permute.xlu2 %1238 }
 0x9fd   :  { %v1341_v3 = vpop.permute.xlu2 %1340 }
 0x9fe   :  { %1992 = vmatmul.msk.f32.vlgmr.msra.gmra.mxu0 %vm268_vm7, %v1341_v3 }
 0xa05   :  { %v1369_v8 = vpop.permute.xlu2 %1368 }
 0xa0d   :  { %v1371_v5 = vpop.permute.xlu1 %1370  ;;  %v1501_v45 = vpop.permute.xlu2 %1500 }
 0xa0e   :  { %v1107_v4 = vpop.permute.xlu0 %1106 }
 0xa0f   :  { %1981 = vmatpush.xpose.msk.msra.mxu1 %vm268_vm7, %v1107_v4 }
 0xa12   :  { %1982 = vmatmul.msk.f32.vlgmr.msra.gmra.mxu1 %vm268_vm7, %v2562_v60 }
 0xa13   :  { %1987 = vmatpush.xpose.msk.msrb.mxu1 %vm268_vm7, %v1239_v2 }
 0xa15   :  { %v1473_v9 = vpop.permute.xlu1 %1472 }
 0xa16   :  { %v1237_v6 = vpop.permute.xlu0 %1236 }
 0xa17   :  { %1993 = vmatpush.xpose.msk.msra.mxu1 %vm268_vm7, %v1371_v5 }
 0xa1a   :  { %1988 = vmatmul.msk.f32.vlgmr.msrb.gmra.mxu1 %vm268_vm7, %v1237_v6 }
 0xa1e   :  { %v1475_v7 = vpop.permute.xlu0 %1474 }
 0xa1f   :  { %1997 = vmatpush.xpose.msk.msrb.mxu0 %vm268_vm7, %v1475_v7 }
 0xa22   :  { %1994 = vmatmul.msk.f32.vlgmr.msra.gmra.mxu1 %vm268_vm7, %v1369_v8  ;;  %1998 = vmatmul.msk.f32.vlgmr.msrb.gmra.mxu0 %vm268_vm7, %v1473_v9 }
 0xa26   :  { %v1503_v43 = vpop.permute.xlu0 %1502 }
 0xa27   :  { %1999 = vmatpush.xpose.msk.msrb.mxu1 %vm268_vm7, %v1503_v43 }
 0xa2a   :  { %2000 = vmatmul.msk.f32.vlgmr.msrb.gmra.mxu1 %vm268_vm7, %v1501_v45 }
 0xa54   :  { %v1102_v10 = vpop.f32.mrf.mxu0 }
 0xa55   :  { %v1132_v11 = vmul.f32 0.35355338, %v1102_v10 }
 0xa57   :  { %v1134_v38 = vsel %vm268_vm7, %v1132_v11, -inf }
 0xa58   :  { %1135 = vmax.xlane.f32.xlu1 %v1134_v38 }
 0xa6d   :  { %v1233_v13 = vpop.f32.mrf.mxu0 }
 0xa6e   :  { %v1264_v14 = vmul.f32 0.35355338, %v1233_v13 }
 0xa70   :  { %v1266_v15 = vsel %vm268_vm7, %v1264_v14, -inf }
 0xa71   :  { %1267 = vmax.xlane.f32.xlu2 %v1266_v15 }
 0xa7b   :  { %v1365_v40 = vpop.f32.mrf.mxu0 }
 0xa7c   :  { %v1396_v16 = vmul.f32 0.35355338, %v1365_v40 }
 0xa7e   :  { %v1398_v17 = vsel %vm268_vm7, %v1396_v16, -inf }
 0xa7f   :  { %1399 = vmax.xlane.f32.xlu2 %v1398_v17 }
 0xa8f   :  { %v1129_v18 = vpop.f32.mrf.mxu1 }
 0xa90   :  { %v1133_v19 = vmul.f32 0.35355338, %v1129_v18 }
 0xa92   :  { %v1137_v20 = vsel %vm268_vm7, %v1133_v19, -inf }
 0xa93   :  { %1138 = vmax.xlane.f32.xlu0 %v1137_v20 }
 0xa97   :  { %v1261_v21 = vpop.f32.mrf.mxu1 }
 0xa98   :  { %v1265_v22 = vmul.f32 0.35355338, %v1261_v21 }
 0xa9a   :  { %v1269_v23 = vsel %vm268_vm7, %v1265_v22, -inf }
 0xa9b   :  { %1270 = vmax.xlane.f32.xlu1 %v1269_v23 }
 0xa9f   :  { %v1393_v24 = vpop.f32.mrf.mxu1  ;;  %v1497_v25 = vpop.f32.mrf.mxu0 }
 0xaa0   :  { %v1397_v26 = vmul.f32 0.35355338, %v1393_v24  ;;  %v1528_v27 = vmul.f32 0.35355338, %v1497_v25 }
 0xaa2   :  { %v1530_v28 = vsel %vm268_vm7, %v1528_v27, -inf  ;;  %v1401_v29 = vsel %vm268_vm7, %v1397_v26, -inf }
 0xaa3   :  { %1531 = vmax.xlane.f32.xlu1 %v1530_v28  ;;  %1402 = vmax.xlane.f32.xlu0 %v1401_v29 }
 0xaa7   :  { %v1525_v30 = vpop.f32.mrf.mxu1 }
 0xaa8   :  { %v1529_v31 = vmul.f32 0.35355338, %v1525_v30 }
 0xaaa   :  { %v1533_v32 = vsel %vm268_vm7, %v1529_v31, -inf }
 0xaab   :  { %1534 = vmax.xlane.f32.xlu2 %v1533_v32 }
 0xacb   :  { %v1136_v33 = vpop.xlane.xlu1 %1135 }
 0xacc   :  { %v1140_v34 = vsub.f32 %v1132_v11, %v1136_v33 }
 0xace   :  { %v1142_v35 = vmul.f32 1.442695, %v1140_v34 }
 0xad0   :  { %2112 = vpow2.f32 %v1142_v35 }
 0xad6   :  { %v2610_v36 = vpop.eup %2112 }
 0xad7   :  { %v1146_v37 = vsel %vm268_vm7, %v2610_v36, 0.0 }
 0xad8   :  { %1147 = vadd.xlane.f32.xlu0 %v1146_v37 }
 0xae4   :  { %v1268_v39 = vpop.xlane.xlu2 %1267 }
 0xae5   :  { %v1272_v42 = vsub.f32 %v1264_v14, %v1268_v39 }
 0xae7   :  { %v1274_v44 = vmul.f32 1.442695, %v1272_v42 }
 0xae9   :  { %2114 = vpow2.f32 %v1274_v44 }
 0xaec   :  { %2051 = vrot.lane.b32.xlu0 %v2050_v46, %s2287_s22 }
 0xaef   :  { %v2617_v47 = vpop.eup %2114 }
 0xaf0   :  { %v1278_v48 = vsel %vm268_vm7, %v2617_v47, 0.0 }
 0xaf1   :  { %1279 = vadd.xlane.f32.xlu2 %v1278_v48 }
 0xaf2   :  { %v1400_v49 = vpop.xlane.xlu2 %1399 }
 0xaf3   :  { %v1404_v50 = vsub.f32 %v1396_v16, %v1400_v49 }
 0xaf5   :  { %v1406_v51 = vmul.f32 1.442695, %v1404_v50 }
 0xaf7   :  { %2116 = vpow2.f32 %v1406_v51 }
 0xafd   :  { %v2621_v52 = vpop.eup %2116 }
 0xafe   :  { %v1410_v62 = vsel %vm268_vm7, %v2621_v52, 0.0 }
 0xaff   :  { %1411 = vadd.xlane.f32.xlu2 %v1410_v62 }
 0xb06   :  { %v1139_v53 = vpop.xlane.xlu0 %1138 }
 0xb07   :  { %v1141_v54 = vsub.f32 %v1133_v19, %v1139_v53 }
 0xb09   :  { %v1144_v56 = vmul.f32 1.442695, %v1141_v54 }
 0xb0b   :  { %2118 = vpow2.f32 %v1144_v56 }
 0xb0e   :  { %v1271_v57 = vpop.xlane.xlu1 %1270 }
 0xb0f   :  { %v1273_v59 = vsub.f32 %v1265_v22, %v1271_v57 }
 0xb11   :  { %v2119_v61 = vpop.eup %2118  ;;  %v1276_v63 = vmul.f32 1.442695, %v1273_v59 }
 0xb12   :  { %v1149_v0 = vsel %vm268_vm7, %v2119_v61, 0.0 }
 0xb13   :  { %2120 = vpow2.f32 %v1276_v63  ;;  %1150 = vadd.xlane.f32.xlu1 %v1149_v0  ;;  %v1037_v0 = vld [vmem:[#allocation9 + $0x78] sm:$0xff] }
 0xb14   :  { %1653 = vmatpush.msra.mxu0 %v1037_v0 }
 0xb16   :  { %v1532_v1 = vpop.xlane.xlu1 %1531  ;;  %v1403_v8 = vpop.xlane.xlu0 %1402 }
 0xb17   :  { %v1536_v2 = vsub.f32 %v1528_v27, %v1532_v1  ;;  %2061 = vrot.lane.b32.xlu2 %v2050_v46, %s2288_s5  ;;  %v1405_v9 = vsub.f32 %v1397_v26, %v1403_v8  ;;  %v1036_v1 = vld [vmem:[#allocation9 + $0x70] sm:$0xff] }
 0xb18   :  { %1654 = vmatpush.msra.mxu0 %v1036_v1 }
 0xb19   :  { %v2121_v3 = vpop.eup %2120  ;;  %v1538_v4 = vmul.f32 1.442695, %v1536_v2  ;;  %v1408_v43 = vmul.f32 1.442695, %v1405_v9  ;;  %v1035_v2 = vld [vmem:[#allocation9 + $0x68] sm:$0xff] }
 0xb1a   :  { %v1281_v5 = vsel %vm268_vm7, %v2121_v3, 0.0  ;;  %1655 = vmatpush.msra.mxu0 %v1035_v2 }
 0xb1b   :  { %2122 = vpow2.f32 %v1538_v4  ;;  %1282 = vadd.xlane.f32.xlu1 %v1281_v5 }
 0xb1c   :  { %2124 = vpow2.f32 %v1408_v43 }
 0xb1e   :  { %v1535_v11 = vpop.xlane.xlu2 %1534 }
 0xb1f   :  { %v1537_v38 = vsub.f32 %v1529_v31, %v1535_v11 }
 0xb21   :  { %v2628_v6 = vpop.eup %2122  ;;  %v1540_v13 = vmul.f32 1.442695, %v1537_v38 }
 0xb22   :  { %v1542_v7 = vsel %vm268_vm7, %v2628_v6, 0.0  ;;  %v2125_v45 = vpop.eup %2124 }
 0xb23   :  { %1543 = vadd.xlane.f32.xlu0 %v1542_v7  ;;  %v1413_v10 = vsel %vm268_vm7, %v2125_v45, 0.0  ;;  %2126 = vpow2.f32 %v1540_v13 }
 0xb29   :  { %v2127_v15 = vpop.eup %2126 }
 0xb2a   :  { %v1545_v16 = vsel %vm268_vm7, %v2127_v15, 0.0 }
 0xb34   :  { %2056 = vrot.lane.b32.xlu1 %v2050_v46, %s2289_s23 }
 0xb40   :  { %1414 = vadd.xlane.f32.xlu2 %v1413_v10 }
 0xb4b   :  { %v1148_v14 = vpop.xlane.xlu0 %1147 }
 0xb4c   :  { %2128 = vrcp.f32 %v1148_v14  ;;  %v2668_v14 = vld [vmem:[%s2725_s8 + $0x8] sm:$0x7f]  ;;  %s2295_s8 = smov [#allocation10]  }
 0xb4d   :  { %s1922_s7 = sshll.u32 %s2295_s8, 4  ;;  %s1923_s7 = int_to_ptr.vmem [resolvable:$true] %s1922_s7 }
 0xb52   :  { %v2129_v40 = vpop.eup %2128 }
 0xb53   :  { %v1154_v20 = vmul.f32 %v2129_v40, %v2610_v36 }
 0xb58   :  { %1552 = vrot.lane.b32.xlu2 %v2552_v58, %s2290_s24 }
 0xb5e   :  { %1546 = vadd.xlane.f32.xlu1 %v1545_v16  ;;  %v2052_v17 = vpop.permute.xlu0 %2051 }
 0xb5f   :  { %v2054_v18 = vunpack.i.h.bf16 %v2052_v17  ;;  %v2053_v19 = vunpack.i.l.bf16 %v2052_v17 }
 0xb60   :  { %1578 = vrot.lane.b32.xlu2 %v2562_v60, %s2290_s24 }
 0xb61   :  { %1177 = vmatpush.msra.mxu2 %v2053_v19  ;;  %1203 = vmatpush.msrb.mxu3 %v2054_v18 }
 0xb62   :  { %1983 = vmatmul.msk.f32.vlgmr.msra.gmra.mxu2 %vm268_vm7, %v1154_v20 }
 0xb64   :  { %v1280_v23 = vpop.xlane.xlu2 %1279 }
 0xb72   :  { %v1412_v24 = vpop.xlane.xlu2 %1411 }
 0xb7a   :  { %v2062_v28 = vpop.permute.xlu2 %2061 }
 0xb7b   :  { %v2064_v33 = vunpack.i.h.bf16 %v2062_v28  ;;  %v2063_v34 = vunpack.i.l.bf16 %v2062_v28 }
 0xb86   :  { %v1151_v21 = vpop.xlane.xlu1 %1150 }
 0xb87   :  { %2130 = vrcp.f32 %v1151_v21 }
 0xb88   :  { %2132 = vrcp.f32 %v1280_v23 }
 0xb8d   :  { %v2131_v58 = vpop.eup %2130 }
 0xb8e   :  { %v1155_v22 = vmul.f32 %v2131_v58, %v2119_v61  ;;  %v1283_v25 = vpop.xlane.xlu1 %1282  ;;  %v2133_v26 = vpop.eup %2132 }
 0xb8f   :  { %2134 = vrcp.f32 %v1283_v25  ;;  %v1286_v31 = vmul.f32 %v2133_v26, %v2617_v47 }
 0xb90   :  { %1984 = vmatmul.msk.f32.vlgmr.msrb.gmra.mxu3 %vm268_vm7, %v1155_v22  ;;  %2136 = vrcp.f32 %v1412_v24 }
 0xb95   :  { %v2135_v27 = vpop.eup %2134 }
 0xb96   :  { %v1287_v32 = vmul.f32 %v2135_v27, %v2121_v3  ;;  %v2137_v35 = vpop.eup %2136  ;;  %v1544_v36 = vpop.xlane.xlu0 %1543  ;;  %v1034_v3 = vld [vmem:[#allocation9 + $0x60] sm:$0xff] }
 0xb97   :  { %v1418_v37 = vmul.f32 %v2137_v35, %v2621_v52  ;;  %2138 = vrcp.f32 %v1544_v36  ;;  %1656 = vmatpush.msra.mxu0 %v1034_v3 }
 0xb9d   :  { %v2139_v42 = vpop.eup %2138 }
 0xb9e   :  { %v1550_v46 = vmul.f32 %v2139_v42, %v2628_v6 }
 0xba6   :  { %v2057_v29 = vpop.permute.xlu1 %2056 }
 0xba7   :  { %v2059_v60 = vunpack.i.h.bf16 %v2057_v29  ;;  %v2058_v30 = vunpack.i.l.bf16 %v2057_v29 }
 0xba9   :  { %1309 = vmatpush.msrb.mxu2 %v2058_v30  ;;  %1335 = vmatpush.msra.mxu3 %v2059_v60  ;;  %v1040_v30 = vld [vmem:[#allocation9 + $0x90] sm:$0xff] }
 0xbaa   :  { %1989 = vmatmul.msk.f32.vlgmr.msrb.gmra.mxu2 %vm268_vm7, %v1286_v31  ;;  %1990 = vmatmul.msk.f32.vlgmr.msra.gmra.mxu3 %vm268_vm7, %v1287_v32  ;;  %v1039_v31 = vld [vmem:[#allocation9 + $0x88] sm:$0xff]  ;;  %v1038_v32 = vld [vmem:[#allocation9 + $0x80] sm:$0xff] }
 0xbab   :  { %1441 = vmatpush.msra.mxu2 %v2063_v34  ;;  %1467 = vmatpush.msrb.mxu3 %v2064_v33 }
 0xbb2   :  { %1995 = vmatmul.msk.f32.vlgmr.msra.gmra.mxu2 %vm268_vm7, %v1418_v37 }
 0xbb3   :  { %v1415_v39 = vpop.xlane.xlu2 %1414 }
 0xbb4   :  { %2140 = vrcp.f32 %v1415_v39 }
 0xbba   :  { %v2141_v44 = vpop.eup %2140 }
 0xbbb   :  { %v1419_v47 = vmul.f32 %v2141_v44, %v2125_v45  ;;  %v1553_v48 = vpop.permute.xlu2 %1552 }
 0xbbc   :  { %1573 = vmatpush.msrb.mxu2 %v1553_v48 }
 0xbbd   :  { %1996 = vmatmul.msk.f32.vlgmr.msrb.gmra.mxu3 %vm268_vm7, %v1419_v47  ;;  %2001 = vmatmul.msk.f32.vlgmr.msrb.gmra.mxu2 %vm268_vm7, %v1550_v46  ;;  %v1710_v47 = vperm.slane %v2668_v14, 1 }
 0xbc3   :  { %v1579_v49 = vpop.permute.xlu2 %1578 }
 0xbc4   :  { %1599 = vmatpush.msra.mxu3 %v1579_v49 }
 0xbd1   :  { %v1547_v50 = vpop.xlane.xlu1 %1546 }
 0xbd2   :  { %2142 = vrcp.f32 %v1547_v50  ;;  %v1713_v50 = vperm.slane %v2668_v14, 2 }
 0xbd8   :  { %v2143_v51 = vpop.eup %2142 }
 0xbd9   :  { %v1551_v52 = vmul.f32 %v2143_v51, %v2127_v15  ;;  %v1634_v15 = vperm.slane %v2668_v14, 0 }
 0xbdb   :  { %2002 = vmatmul.msk.f32.vlgmr.msra.gmra.mxu3 %vm268_vm7, %v1551_v52 }
 0xbe5   :  { %v1179_v62 = vpop.f32.mrf.mxu2 }
 0xc13   :  { %v1205_v54 = vpop.f32.mrf.mxu3 }
 0xc2d   :  { %v1311_v53 = vpop.f32.mrf.mxu2  ;;  %v1337_v57 = vpop.f32.mrf.mxu3 }
 0xc2e   :  { %1606 = vrot.lane.b32.xlu0 %v1311_v53, %s2276_s18 }
 0xc35   :  { %v1443_v56 = vpop.f32.mrf.mxu2 }
 0xc36   :  { %1614 = vrot.lane.b32.xlu2 %v1443_v56, %s2291_s25 }
 0xc40   :  { %v1469_v59 = vpop.f32.mrf.mxu3  ;;  %v1575_v61 = vpop.f32.mrf.mxu2 }
 0xc41   :  { %1616 = vrot.lane.b32.xlu0 %v1469_v59, %s2291_s25  ;;  %1622 = vrot.lane.b32.xlu2 %v1575_v61, %s2292_s26 }
 0xc49   :  { %1608 = vrot.lane.b32.xlu2 %v1337_v57, %s2276_s18 }
 0xc5e   :  { %v1601_v63 = vpop.f32.mrf.mxu3 }
 0xc5f   :  { %1624 = vrot.lane.b32.xlu1 %v1601_v63, %s2292_s26 }
 0xc90   :  { %v1615_v4 = vpop.permute.xlu2 %1614 }
 0xc9b   :  { %v1623_v7 = vpop.permute.xlu2 %1622 }
 0xca0   :  { %v1607_v5 = vpop.permute.xlu0 %1606 }
 0xca1   :  { %v1628_v6 = vsel %vm268_vm7, %v1179_v62, %v1607_v5  ;;  %v1045_v62 = vld [vmem:[#allocation9 + $0xb8] sm:$0xff] }
 0xca2   :  { %v1630_v8 = vsel %vm818_vm8, %v1628_v6, %v1615_v4  ;;  %1767 = vmatpush.msra.mxu2 %v1045_v62  ;;  %v1044_v6 = vld [vmem:[#allocation9 + $0xb0] sm:$0xff] }
 0xca3   :  { %v1632_v9 = vsel %vm821_vm9, %v1630_v8, %v1623_v7  ;;  %v1609_v43 = vpop.permute.xlu2 %1608  ;;  %v1043_v7 = vld [vmem:[#allocation9 + $0xa8] sm:$0xff]  ;;  %v1042_v8 = vld [vmem:[#allocation9 + $0xa0] sm:$0xff] }
 0xca4   :  { %2003 = vmatmul.msk.f32.vlgmr.msra.gmra.mxu0 %vm149_vm3, %v1632_v9  ;;  %v1629_v10 = vsel %vm268_vm7, %v1205_v54, %v1609_v43  ;;  %1768 = vmatpush.msra.mxu2 %v1044_v6  ;;  %v1716_v9 = vperm.slane %v2668_v14, 3 }
 0xca6   :  { %1769 = vmatpush.msra.mxu2 %v1043_v7 }
 0xca8   :  { %1770 = vmatpush.msra.mxu2 %v1042_v8 }
 0xcb3   :  { %v1617_v45 = vpop.permute.xlu0 %1616 }
 0xcb4   :  { %v1631_v11 = vsel %vm818_vm8, %v1629_v10, %v1617_v45 }
 0xcd1   :  { %v1625_v38 = vpop.permute.xlu1 %1624 }
 0xcd2   :  { %v1633_v13 = vsel %vm821_vm9, %v1631_v11, %v1625_v38 }
 0xcd3   :  { %2004 = vmatmul.msk.f32.gmra.mxu0 %vm149_vm3, %v1633_v13 }
 0xd21   :  { %v1658_v40 = vpop.f32.mrf.mxu0 }
 0xd22   :  { %v1659_v16 = vadd.f32 %v1658_v40, %v1634_v15 }
 0xd24   :  { %v1664_v17 = vadd.f32 %v1659_v16, %v2540_v41 }
 0xd26   :  { %v1666_v18 = vsel %vm149_vm3, %v1664_v17, 0.0 }
 0xd27   :  { %1667 = vadd.xlane.f32.xlu2 %v1666_v18 }
 0xd50   :  { %v1661_v19 = vpop.f32.mrf.mxu0 }
 0xd51   :  { %v1662_v20 = vadd.f32 %v1661_v19, %v1634_v15  ;;  %v1748_v15 = vperm.slane %v2668_v14, 4 }
 0xd53   :  { %v1665_v21 = vadd.f32 %v1662_v20, %v2545_v55  ;;  %v1041_v55 = vld [vmem:[#allocation9 + $0x98] sm:$0xff] }
 0xd54   :  { %1735 = vmatpush.msra.mxu1 %v1041_v55 }
 0xd55   :  { %v1669_v58 = vsel %vm149_vm3, %v1665_v21, 0.0 }
 0xd56   :  { %1670 = vadd.xlane.f32.xlu0 %v1669_v58  ;;  %1736 = vmatpush.msra.mxu1 %v1040_v30 }
 0xd58   :  { %1737 = vmatpush.msra.mxu1 %v1039_v31 }
 0xd5a   :  { %1738 = vmatpush.msra.mxu1 %v1038_v32 }
 0xd9a   :  { %v1668_v22 = vpop.xlane.xlu2 %1667 }
 0xd9b   :  { %v1672_v23 = vmul.f32 %v1668_v22, %v2515_v12 }
 0xd9d   :  { %v1674_v24 = vsub.f32 %v1664_v17, %v1672_v23 }
 0xd9f   :  { %v1676_v25 = vmul.f32 %v1674_v24, %v1674_v24 }
 0xda1   :  { %v1678_v26 = vsel %vm149_vm3, %v1676_v25, 0.0 }
 0xda2   :  { %1679 = vadd.xlane.f32.xlu1 %v1678_v26 }
 0xdc9   :  { %v1671_v27 = vpop.xlane.xlu0 %1670 }
 0xdca   :  { %v1673_v41 = vmul.f32 %v1671_v27, %v2515_v12 }
 0xdcc   :  { %v1675_v28 = vsub.f32 %v1665_v21, %v1673_v41 }
 0xdce   :  { %v1677_v29 = vmul.f32 %v1675_v28, %v1675_v28 }
 0xdd0   :  { %v1681_v60 = vsel %vm149_vm3, %v1677_v29, 0.0 }
 0xdd1   :  { %1682 = vadd.xlane.f32.xlu2 %v1681_v60 }
 0xe15   :  { %v1680_v33 = vpop.xlane.xlu1 %1679 }
 0xe16   :  { %v1684_v34 = vmul.f32 %v1680_v33, %v2515_v12 }
 0xe18   :  { %v1686_v35 = vadd.f32 1e-05, %v1684_v34 }
 0xe1a   :  { %2144 = vrsqrt.f32 %v1686_v35  ;;  %vm1694_vm8 = vweird.f32 %v1686_v35 }
 0xe20   :  { %v2145_v36 = vpop.eup %2144 }
 0xe21   :  { %v1689_v37 = vmul.f32 %v2145_v36, %v1686_v35  ;;  %vm1695_vm7 = vweird.f32 %v2145_v36 }
 0xe22   :  { %vm1696_vm9 = vmor %vm1694_vm8, %vm1695_vm7 }
 0xe23   :  { %v1690_v39 = vmul.f32 %v2145_v36, %v1689_v37 }
 0xe25   :  { %v1691_v42 = vmul.f32 0.5, %v1690_v39  ;;  %v1824_v39 = vperm.slane %v2668_v14, 5 }
 0xe27   :  { %v1692_v44 = vsub.f32 1.5, %v1691_v42 }
 0xe29   :  { %v1693_v46 = vmul.f32 %v2145_v36, %v1692_v44 }
 0xe2b   :  { %v1697_v48 = vsel %vm1696_vm9, %v2145_v36, %v1693_v46  ;;  %v1827_v46 = vperm.slane %v2668_v14, 6 }
 0xe2c   :  { %v1708_v49 = vmul.f32 %v1697_v48, %v1674_v24 }
 0xe2e   :  { %v1711_v51 = vmul.f32 %v1710_v47, %v1708_v49 }
 0xe30   :  { %v1714_v52 = vadd.f32 %v1713_v50, %v1711_v51 }
 0xe32   :  { %2005 = vmatmul.msk.f32.vlgmr.msra.gmra.mxu1 %vm149_vm3, %v1714_v52 }
 0xe44   :  { %v1683_v53 = vpop.xlane.xlu2 %1682 }
 0xe45   :  { %v1685_v54 = vmul.f32 %v1683_v53, %v2515_v12 }
 0xe47   :  { %v1687_v56 = vadd.f32 1e-05, %v1685_v54 }
 0xe49   :  { %2146 = vrsqrt.f32 %v1687_v56  ;;  %vm1704_vm12 = vweird.f32 %v1687_v56 }
 0xe4f   :  { %v2147_v57 = vpop.eup %2146 }
 0xe50   :  { %v1699_v59 = vmul.f32 %v2147_v57, %v1687_v56  ;;  %vm1705_vm11 = vweird.f32 %v2147_v57 }
 0xe51   :  { %vm1706_vm13 = vmor %vm1704_vm12, %vm1705_vm11 }
 0xe52   :  { %v1700_v61 = vmul.f32 %v2147_v57, %v1699_v59 }
 0xe54   :  { %v1701_v63 = vmul.f32 0.5, %v1700_v61 }
 0xe56   :  { %v1702_v0 = vsub.f32 1.5, %v1701_v63 }
 0xe58   :  { %v1703_v1 = vmul.f32 %v2147_v57, %v1702_v0 }
 0xe5a   :  { %v1707_v2 = vsel %vm1706_vm13, %v2147_v57, %v1703_v1 }
 0xe5b   :  { %v1709_v3 = vmul.f32 %v1707_v2, %v1675_v28  ;;  %v1840_v2 = vlaneseq }
 0xe5d   :  { %v1712_v4 = vmul.f32 %v1710_v47, %v1709_v3 }
 0xe5f   :  { %v1715_v5 = vadd.f32 %v1713_v50, %v1712_v4  ;;  %v1841_v4 = vand.u32 127, %v1840_v2 }
 0xe61   :  { %2006 = vmatmul.msk.f32.gmra.mxu1 %vm149_vm3, %v1715_v5 }
 0xeaf   :  { %v1740_v43 = vpop.f32.mrf.mxu1 }
 0xeb0   :  { %v1741_v45 = vadd.f32 %v1740_v43, %v1716_v9 }
 0xeb2   :  { %v1746_v10 = vmax.f32 %v1741_v45, 0.0 }
 0xeb4   :  { %2007 = vmatmul.msk.f32.vlgmr.msra.gmra.mxu2 %vm149_vm3, %v1746_v10  ;;  %v2294_v10 = vmov 0  }
 0xeb5   :  { %2066 = vset.pattern.permute.xlu1 %v2294_v10  ;;  %2065 = vset.pattern.permute.xlu0 %v2294_v10 }
 0xeb6   :  { %2067 = vset.pattern.permute.xlu2 %v2294_v10 }
 0xede   :  { %v1743_v11 = vpop.f32.mrf.mxu1 }
 0xedf   :  { %v1744_v38 = vadd.f32 %v1743_v11, %v1716_v9 }
 0xee1   :  { %v1747_v13 = vmax.f32 %v1744_v38, 0.0 }
 0xee3   :  { %2008 = vmatmul.msk.f32.gmra.mxu2 %vm149_vm3, %v1747_v13 }
 0xf37   :  { %v1772_v40 = vpop.f32.mrf.mxu2 }
 0xf38   :  { %v1773_v16 = vadd.f32 %v1772_v40, %v1748_v15 }
 0xf3a   :  { %v1778_v17 = vadd.f32 %v1773_v16, %v1714_v52 }
 0xf3c   :  { %v1780_v18 = vsel %vm149_vm3, %v1778_v17, 0.0 }
 0xf3d   :  { %1781 = vadd.xlane.f32.xlu0 %v1780_v18 }
 0xf66   :  { %v1775_v19 = vpop.f32.mrf.mxu2 }
 0xf67   :  { %v1776_v20 = vadd.f32 %v1775_v19, %v1748_v15 }
 0xf69   :  { %v1779_v21 = vadd.f32 %v1776_v20, %v1715_v5 }
 0xf6b   :  { %v1783_v58 = vsel %vm149_vm3, %v1779_v21, 0.0 }
 0xf6c   :  { %1784 = vadd.xlane.f32.xlu2 %v1783_v58 }
 0xfb0   :  { %v1782_v22 = vpop.xlane.xlu0 %1781 }
 0xfb1   :  { %v1786_v23 = vmul.f32 %v1782_v22, %v2515_v12 }
 0xfb3   :  { %v1788_v24 = vsub.f32 %v1778_v17, %v1786_v23 }
 0xfb5   :  { %v1790_v25 = vmul.f32 %v1788_v24, %v1788_v24 }
 0xfb7   :  { %v1792_v26 = vsel %vm149_vm3, %v1790_v25, 0.0 }
 0xfb8   :  { %1793 = vadd.xlane.f32.xlu0 %v1792_v26 }
 0xfdf   :  { %v1785_v27 = vpop.xlane.xlu2 %1784 }
 0xfe0   :  { %v1787_v41 = vmul.f32 %v1785_v27, %v2515_v12 }
 0xfe2   :  { %v1789_v28 = vsub.f32 %v1779_v21, %v1787_v41 }
 0xfe4   :  { %v1791_v29 = vmul.f32 %v1789_v28, %v1789_v28 }
 0xfe6   :  { %v1795_v60 = vsel %vm149_vm3, %v1791_v29, 0.0 }
 0xfe7   :  { %1796 = vadd.xlane.f32.xlu2 %v1795_v60 }
0x102b   :  { %v1794_v55 = vpop.xlane.xlu0 %1793 }
0x102c   :  { %v1798_v30 = vmul.f32 %v1794_v55, %v2515_v12 }
0x102e   :  { %v1800_v31 = vadd.f32 1e-05, %v1798_v30 }
0x1030   :  { %2148 = vrsqrt.f32 %v1800_v31  ;;  %vm1808_vm15 = vweird.f32 %v1800_v31 }
0x1036   :  { %v2149_v32 = vpop.eup %2148 }
0x1037   :  { %v1803_v33 = vmul.f32 %v2149_v32, %v1800_v31  ;;  %vm1809_vm14 = vweird.f32 %v2149_v32 }
0x1038   :  { %vm1810_vm0 = vmor %vm1808_vm15, %vm1809_vm14 }
0x1039   :  { %v1804_v34 = vmul.f32 %v2149_v32, %v1803_v33 }
0x103b   :  { %v1805_v35 = vmul.f32 0.5, %v1804_v34 }
0x103d   :  { %v1806_v36 = vsub.f32 1.5, %v1805_v35 }
0x103f   :  { %v1807_v37 = vmul.f32 %v2149_v32, %v1806_v36 }
0x1041   :  { %v1811_v42 = vsel %vm1810_vm0, %v2149_v32, %v1807_v37 }
0x1042   :  { %v1822_v44 = vmul.f32 %v1811_v42, %v1788_v24 }
0x1044   :  { %v1825_v47 = vmul.f32 %v1824_v39, %v1822_v44 }
0x1046   :  { %v2698_v48 = vadd.f32 %v1827_v46, %v1825_v47 }
0x1048   :  { %v1830_v49 = vsel %vm149_vm3, %v2698_v48, 0.0 }
0x1049   :  { %1831 = vadd.xlane.f32.xlu0 %v1830_v49 }
0x105a   :  { %v1797_v50 = vpop.xlane.xlu2 %1796 }
0x105b   :  { %v1799_v51 = vmul.f32 %v1797_v50, %v2515_v12 }
0x105d   :  { %v1801_v52 = vadd.f32 1e-05, %v1799_v51 }
0x105f   :  { %2150 = vrsqrt.f32 %v1801_v52  ;;  %vm1818_vm2 = vweird.f32 %v1801_v52 }
0x1065   :  { %v2151_v62 = vpop.eup %2150 }
0x1066   :  { %v1813_v53 = vmul.f32 %v2151_v62, %v1801_v52  ;;  %vm1819_vm1 = vweird.f32 %v2151_v62 }
0x1067   :  { %vm1820_vm4 = vmor %vm1818_vm2, %vm1819_vm1 }
0x1068   :  { %v1814_v54 = vmul.f32 %v2151_v62, %v1813_v53 }
0x106a   :  { %v1815_v56 = vmul.f32 0.5, %v1814_v54 }
0x106c   :  { %v1816_v57 = vsub.f32 1.5, %v1815_v56 }
0x106e   :  { %v1817_v59 = vmul.f32 %v2151_v62, %v1816_v57 }
0x1070   :  { %v1821_v14 = vsel %vm1820_vm4, %v2151_v62, %v1817_v59 }
0x1071   :  { %v1823_v61 = vmul.f32 %v1821_v14, %v1789_v28 }
0x1073   :  { %v1826_v63 = vmul.f32 %v1824_v39, %v1823_v61 }
0x1075   :  { %v1829_v0 = vadd.f32 %v1827_v46, %v1826_v63 }
0x1077   :  { %v1833_v1 = vsel %vm149_vm3, %v1829_v0, 0.0 }
0x1078   :  { %1834 = vadd.xlane.f32.xlu1 %v1833_v1 }
0x10bc   :  { %v1832_v3 = vpop.xlane.xlu0 %1831 }
0x10bd   :  { %v1836_v5 = vmul.f32 %v1832_v3, %v2515_v12 }
0x10bf   :  { %v1842_v8 = vperm.slane %v1836_v5, %v1841_v4 }
0x10eb   :  { %v1835_v6 = vpop.xlane.xlu1 %1834 }
0x10ec   :  { %v1837_v7 = vmul.f32 %v1835_v6, %v2515_v12 }
0x10ee   :  { %v1843_v9 = vperm.slane %v1837_v7, %v1841_v4 }
0x10f0   :  { %v1845_v43 = vsel %vm1844_vm5, %v1843_v9, %v1842_v8 }
0x10f1   :  { %v1848_v45 = vsel %vm1847_vm6, %v1845_v43, -inf }
0x10f2   :  { %1849 = vmax.xlane.f32.xlu2 %v1848_v45 }
0x1165   :  { %v1850_v11 = vpop.xlane.xlu2 %1849 }
0x1166   :  { %v1852_v38 = vperm.slane %v1850_v11, 0  ;;  %v1853_v13 = vperm.slane %v1850_v11, 1 }
0x1168   :  { %v1856_v15 = vsub.f32 %v1836_v5, %v1852_v38  ;;  %v1857_v40 = vsub.f32 %v1837_v7, %v1853_v13 }
0x116a   :  { %v1858_v16 = vmul.f32 1.442695, %v1856_v15  ;;  %v1860_v12 = vmul.f32 1.442695, %v1857_v40 }
0x116c   :  { %2152 = vpow2.f32 %v1858_v16 }
0x116d   :  { %2154 = vpow2.f32 %v1860_v12 }
0x1172   :  { %v2153_v17 = vpop.eup %2152 }
0x1173   :  { %v2155_v18 = vpop.eup %2154  ;;  %1865 = vperm.xlu0 %2065, %v2153_v17  }
0x1174   :  { %1868 = vperm.xlu1 %2066, %v2155_v18  }
0x11e5   :  { %v1866_v19 = vpop.permute.xlu0 %1865 }
0x11e6   :  { %v1869_v20 = vpop.permute.xlu1 %1868  ;;  %v1870_v21 = vperm.slane %v1866_v19, %v1841_v4 }
0x11e7   :  { %v1871_v58 = vperm.slane %v1869_v20, %v1841_v4 }
0x11e9   :  { %v1872_v22 = vsel %vm1844_vm5, %v1871_v58, %v1870_v21 }
0x11ea   :  { %v1874_v23 = vsel %vm1847_vm6, %v1872_v22, 0.0 }
0x11eb   :  { %1875 = vadd.xlane.f32.xlu2 %v1874_v23 }
0x125e   :  { %v1876_v24 = vpop.xlane.xlu2 %1875 }
0x125f   :  { %2156 = vrcp.f32 %v1876_v24 }
0x1265   :  { %v2157_v25 = vpop.eup %2156 }
0x1266   :  { %v1880_v26 = vperm.slane %v2157_v25, 1  ;;  %v1879_v27 = vperm.slane %v2157_v25, 0 }
0x1268   :  { %v1884_v41 = vmul.f32 %v2155_v18, %v1880_v26  ;;  %v1883_v28 = vmul.f32 %v2153_v17, %v1879_v27 }
0x126a   :  { %1892 = vperm.xlu1 %2066, %v1884_v41   ;;  %1887 = vperm.xlu2 %2067, %v1883_v28  }
0x12c4   :  { %v1888_v29 = vpop.permute.xlu2 %1887 }
0x12c5   :  { %v1895_v60 = vmul.f32 %v1888_v29, %v2698_v48 }
0x12c7   :  { %v1897_v55 = vsel %vm149_vm3, %v1895_v60, 0.0 }
0x12c8   :  { %v1898_v30 = vrot.slane %v1897_v55, 4 }
0x12ca   :  { %v1899_v31 = vadd.f32 %v1898_v30, %v1897_v55 }
0x12cc   :  { %v1900_v34 = vrot.slane %v1899_v31, 2 }
0x12ce   :  { %v1901_v37 = vadd.f32 %v1900_v34, %v1899_v31 }
0x12d0   :  { %v1902_v44 = vrot.slane %v1901_v37, 1 }
0x12d2   :  { %v1903_v48 = vadd.f32 %v1902_v44, %v1901_v37 }
0x12dc   :  { %v1893_v32 = vpop.permute.xlu1 %1892 }
0x12dd   :  { %v1896_v33 = vmul.f32 %v1893_v32, %v1829_v0 }
0x12df   :  { %v1904_v35 = vsel %vm149_vm3, %v1896_v33, 0.0 }
0x12e0   :  { %v1905_v36 = vrot.slane %v1904_v35, 4 }
0x12e2   :  { %v1906_v39 = vadd.f32 %v1905_v36, %v1904_v35 }
0x12e4   :  { %v1907_v42 = vrot.slane %v1906_v39, 2 }
0x12e6   :  { %v1908_v46 = vadd.f32 %v1907_v42, %v1906_v39 }
0x12e8   :  { %v1909_v47 = vrot.slane %v1908_v46, 1 }
0x12ea   :  { %v1910_v49 = vadd.f32 %v1909_v47, %v1908_v46 }
0x12ec   :  { %v1913_v50 = vsel %vm1844_vm5, %v1910_v49, %v1903_v48 }
0x12ed   :  { %1916 = vst.msk [vmem:[#allocation10] sm:$0x3] %vm1915_vm10, %v1913_v50 }
0x12ee   :  { %1927 = dma.vmem_to_hbm [thread:$0]  %s1923_s7, 32, %s1925_s10, [#allocation4]  }
0x12ef   :  { %2272 = dma.done.wait [#allocation4], 32  }
0x12f0   :  { %2273 = vsyncadd [#allocation4], 4294967264 }
0x12f1   :  { %1932 = vsyncpa [#allocation3], 1 }
0x12f2   :  { %1933 = vsyncpa [#allocation8], 1 }
0x12f3   :  { %1934 = vsyncpa [#allocation4], 1 }
0x12f4   :  { %1935 = vsyncpa [#allocation5], 1 }

</bundles_post_ra>
